<compile_context>
chip_gen: v6e
topology: v6e:2x2x1
jax: 0.10.0
libtpu: 0.0.40
codegen_flags: <defaults>
</compile_context>

<pallas_src>
import functools

import jax
import jax.numpy as jnp
from jax.experimental import pallas as pl
from jax.experimental.pallas import tpu as pltpu


# ------------------------------ kernel ------------------------------------ #

def _ln(x, w, b, eps=1e-5):
    # LayerNorm over the last dim, in fp32 (matches the fp16-safe LayerNorm).
    mu = jnp.mean(x, axis=-1, keepdims=True)
    var = jnp.mean((x - mu) ** 2, axis=-1, keepdims=True)
    return (x - mu) * jax.lax.rsqrt(var + eps) * w + b


def _bf16(x):
    return x.astype(jnp.bfloat16)


def transformer_kernel(H,
                       x_ref,
                       ln1w_ref, ln1b_ref, wqkv_ref, bqkv_ref, wo_ref, bo_ref,
                       ln2w_ref, ln2b_ref, wfc_ref, bfc_ref, wproj_ref, bproj_ref,
                       out_ref,
                       o_scratch):
    """grid = (batch_tiles, layers): one ResidualAttentionBlock per inner step.

    The (TB, L, D) activation slab for the current batch tile is resident in
    the output block across the layer axis; the weights of layer
    `pl.program_id(1)` are streamed in by their BlockSpecs.
    """
    layer = pl.program_id(1)

    # Layer 0: seed the resident activation slab from the input.
    @pl.when(layer == 0)
    def _():
        out_ref[...] = x_ref[...]

    x = out_ref[...]                               # (TB, L, D) fp32, resident
    TB, L, D = x.shape
    Dh = D // H

    # --- attention branch: x + out_proj(MHA(ln_1(x))) ---
    h1 = _ln(x, ln1w_ref[0], ln1b_ref[0])                        # fp32 (TB, L, D)

    # Single full-width QKV projection (scale already folded into Q weight/bias).
    qkv = jnp.dot(_bf16(h1.reshape(TB * L, D)), wqkv_ref[0],
                  preferred_element_type=jnp.float32) + bqkv_ref[0]
    qkv = qkv.reshape(TB, L, 3 * D)

    # Per-head attention via static lane slices; each head's context is stored
    # lane-dense into the (TB, L, D) scratch at lane offset h*Dh.
    for h in range(H):
        qh = _bf16(qkv[:, :, h * Dh:(h + 1) * Dh])               # (TB, L, Dh)
        kh = _bf16(qkv[:, :, D + h * Dh:D + (h + 1) * Dh])
        vh = _bf16(qkv[:, :, 2 * D + h * Dh:2 * D + (h + 1) * Dh])
        s = jnp.einsum('bld,bmd->blm', qh, kh,
                       preferred_element_type=jnp.float32)       # (TB, L, L) fp32
        s = s - jnp.max(s, axis=-1, keepdims=True)
        p = jnp.exp(s)
        p = p * pl.reciprocal(jnp.sum(p, axis=-1, keepdims=True), approx=True)
        oh = jnp.einsum('blm,bmd->bld', _bf16(p), vh,
                        preferred_element_type=jnp.float32)      # (TB, L, Dh)
        o_scratch[:, :, h * Dh:(h + 1) * Dh] = oh

    # Full-width (K = D) output projection from the lane-dense scratch.
    attn = jnp.dot(_bf16(o_scratch[...].reshape(TB * L, D)), wo_ref[0],
                   preferred_element_type=jnp.float32) + bo_ref[0]
    x1 = x + attn.reshape(TB, L, D)

    # --- MLP branch: x + c_proj(QuickGELU(c_fc(ln_2(x)))) ---
    h2 = _ln(x1, ln2w_ref[0], ln2b_ref[0])
    f = jnp.dot(_bf16(h2.reshape(TB * L, D)), wfc_ref[0],
                preferred_element_type=jnp.float32) + bfc_ref[0]
    f = f * jax.nn.sigmoid(1.702 * f)                            # QuickGELU (fp32)
    f = jnp.dot(_bf16(f), wproj_ref[0],
                preferred_element_type=jnp.float32) + bproj_ref[0]

    out_ref[...] = x1 + f.reshape(TB, L, D)


# ------------------------------ wrapper ------------------------------------ #

def _vmem_limit_bytes():
    """Size the VMEM budget from the actual chip (64 MiB fallback)."""
    try:
        info = pltpu.get_tpu_info()
        cap = getattr(info, "vmem_capacity_bytes", None)
        if cap:
            return int(cap) * 3 // 4
    except Exception:
        pass
    return 64 * 1024 * 1024


def transformer_forward(x_lnd, packed, heads, tb_max=8):
    """x_lnd: (L, N, D) seq-first, like the PyTorch module.  Returns (L, N, D)."""
    (ln1w, ln1b, wqkv, bqkv, wo, bo,
     ln2w, ln2b, wfc, bfc, wproj, bproj) = packed
    L, B, D = x_lnd.shape
    layers = ln1w.shape[0]
    H = heads
    F = 4 * D

    # Batch tile: largest divisor of B that is <= tb_max (amortizes the weight
    # stream over TB rows; on v7x keep at least 2 tiles so both TCs get work).
    TB = max(d for d in range(1, min(tb_max, B) + 1) if B % d == 0)
    num_bt = B // TB

    x = jnp.transpose(x_lnd, (1, 0, 2))            # (B, L, D) batch-major

    act = lambda bt, l: (bt, 0, 0)     # activations: per-batch-tile, layer-resident
    wmap = lambda bt, l: (l, 0, 0)     # per-layer weights / biases

    grid_spec = pltpu.PrefetchScalarGridSpec(
        num_scalar_prefetch=0,
        grid=(num_bt, layers),         # batch tiles parallel, layers sequential
        in_specs=[
            pl.BlockSpec((TB, L, D), act),          # x
            pl.BlockSpec((1, 1, D), wmap),          # ln_1 weight
            pl.BlockSpec((1, 1, D), wmap),          # ln_1 bias
            pl.BlockSpec((1, D, 3 * D), wmap),      # fused QKV weight (bf16)
            pl.BlockSpec((1, 1, 3 * D), wmap),      # fused QKV bias
            pl.BlockSpec((1, D, D), wmap),          # out_proj weight (bf16)
            pl.BlockSpec((1, 1, D), wmap),          # out_proj bias
            pl.BlockSpec((1, 1, D), wmap),          # ln_2 weight
            pl.BlockSpec((1, 1, D), wmap),          # ln_2 bias
            pl.BlockSpec((1, D, F), wmap),          # c_fc weight (bf16)
            pl.BlockSpec((1, 1, F), wmap),          # c_fc bias
            pl.BlockSpec((1, F, D), wmap),          # c_proj weight (bf16)
            pl.BlockSpec((1, 1, D), wmap),          # c_proj bias
        ],
        out_specs=pl.BlockSpec((TB, L, D), act),
        scratch_shapes=[pltpu.VMEM((TB, L, D), jnp.float32)],   # per-head context
    )

    # Rough cost hint so XLA schedules the surrounding transposes around us.
    flops = layers * B * (24 * L * D * D + 4 * L * L * D)
    transcendentals = layers * B * (H * L * L + L * F)
    weight_bytes = sum(int(a.size) * a.dtype.itemsize for a in
                       (ln1w, ln1b, wqkv, bqkv, wo, bo,
                        ln2w, ln2b, wfc, bfc, wproj, bproj))
    bytes_accessed = num_bt * weight_bytes + 2 * B * L * D * 4

    out = pl.pallas_call(
        functools.partial(transformer_kernel, H),
        grid_spec=grid_spec,
        out_shape=jax.ShapeDtypeStruct((B, L, D), jnp.float32),
        compiler_params=pltpu.CompilerParams(
            dimension_semantics=("parallel", "arbitrary"),
            vmem_limit_bytes=_vmem_limit_bytes()),
        cost_estimate=pl.CostEstimate(
            flops=flops, transcendentals=transcendentals,
            bytes_accessed=bytes_accessed),
    )(x, ln1w, ln1b, wqkv, bqkv, wo, bo, ln2w, ln2b, wfc, bfc, wproj, bproj)

    return jnp.transpose(out, (1, 0, 2))           # back to (L, N, D)


# --------------------------- parameter init -------------------------------- #

def make_layer_params(key, width, layers):
    """Plain per-layer parameters, mirroring Transformer.init_params()."""
    attn_std = width ** -0.5
    proj_std = width ** -0.5 * (2 * layers) ** -0.5
    fc_std = (2 * width) ** -0.5
    k = jax.random.split(key, 6)

    in_proj = attn_std * jax.random.normal(k[0], (3 * width, width), jnp.float32)
    wq = in_proj[0 * width:1 * width].T            # (in, out)
    wk = in_proj[1 * width:2 * width].T
    wv = in_proj[2 * width:3 * width].T
    bqkv = jnp.zeros((1, 3 * width), jnp.float32)  # in_proj_bias is zero-init

    wo = (proj_std * jax.random.normal(k[1], (width, width), jnp.float32)).T
    bo = jnp.zeros((1, width), jnp.float32)        # out_proj.bias is zero-init

    ln1w = jnp.ones((1, width), jnp.float32)
    ln1b = jnp.zeros((1, width), jnp.float32)
    ln2w = jnp.ones((1, width), jnp.float32)
    ln2b = jnp.zeros((1, width), jnp.float32)

    wfc = (fc_std * jax.random.normal(k[2], (4 * width, width), jnp.float32)).T
    bfc = jax.random.uniform(k[3], (1, 4 * width), jnp.float32,
                             -width ** -0.5, width ** -0.5)
    wproj = (proj_std * jax.random.normal(k[4], (width, 4 * width), jnp.float32)).T
    bproj = jax.random.uniform(k[5], (1, width), jnp.float32,
                               -(4 * width) ** -0.5, (4 * width) ** -0.5)

    return (ln1w, ln1b, wq, wk, wv, bqkv, wo, bo,
            ln2w, ln2b, wfc, bfc, wproj, bproj)


def pack_params(layer_params, heads):
    """Stack per-layer params along a leading `layers` axis, fuse the QKV
    weights flat (Q|K|V columns, head-contiguous within each), fold the
    1/sqrt(Dh) attention scale into the Q columns/bias, and cast matmul
    weights to bf16 (biases / LN params stay fp32)."""
    D = layer_params[0][2].shape[0]
    Dh = D // heads
    scale = 1.0 / (Dh ** 0.5)

    def stk(i):
        return jnp.stack([p[i] for p in layer_params])

    ln1w, ln1b = stk(0), stk(1)
    wq, wk, wv = stk(2), stk(3), stk(4)            # (nl, D, D), (in, out)
    bqkv = stk(5)                                  # (nl, 1, 3D)
    wo, bo = stk(6), stk(7)                        # (nl, D, D), (nl, 1, D)
    ln2w, ln2b = stk(8), stk(9)
    wfc, bfc, wproj, bproj = stk(10), stk(11), stk(12), stk(13)

    wqkv = jnp.concatenate([wq * scale, wk, wv], axis=-1)                 # (nl, D, 3D)
    bqkv = jnp.concatenate([bqkv[:, :, :D] * scale, bqkv[:, :, D:]], axis=-1)

    bf16 = lambda a: a.astype(jnp.bfloat16)
    return (ln1w, ln1b, bf16(wqkv), bqkv, bf16(wo), bo,
            ln2w, ln2b, bf16(wfc), bfc, bf16(wproj), bproj)


# ------------------------ plain-JAX reference ------------------------------ #

def _mm(a, w):
    return jnp.dot(a.astype(jnp.bfloat16), w.astype(jnp.bfloat16),
                   preferred_element_type=jnp.float32)


def reference_block(x, p, H):
    (ln1w, ln1b, wq, wk, wv, bqkv, wo, bo,
     ln2w, ln2b, wfc, bfc, wproj, bproj) = p
    B, L, D = x.shape
    Dh = D // H

    def ln(z, w, b):
        m = z.mean(-1, keepdims=True)
        v = ((z - m) ** 2).mean(-1, keepdims=True)
        return (z - m) / jnp.sqrt(v + 1e-5) * w[0] + b[0]

    h = ln(x, ln1w, ln1b)
    q = _mm(h, wq) + bqkv[0, :D]
    k = _mm(h, wk) + bqkv[0, D:2 * D]
    v = _mm(h, wv) + bqkv[0, 2 * D:]
    qh = q.reshape(B, L, H, Dh).transpose(0, 2, 1, 3)
    kh = k.reshape(B, L, H, Dh).transpose(0, 2, 1, 3)
    vh = v.reshape(B, L, H, Dh).transpose(0, 2, 1, 3)
    s = jnp.einsum('bhld,bhmd->bhlm',
                   qh.astype(jnp.bfloat16), kh.astype(jnp.bfloat16),
                   preferred_element_type=jnp.float32) / jnp.sqrt(jnp.float32(Dh))
    pr = jax.nn.softmax(s, axis=-1)
    o = jnp.einsum('bhlm,bhmd->bhld',
                   pr.astype(jnp.bfloat16), vh.astype(jnp.bfloat16),
                   preferred_element_type=jnp.float32)
    o = o.transpose(0, 2, 1, 3).reshape(B, L, D)
    x = x + _mm(o, wo) + bo[0]
    h2 = ln(x, ln2w, ln2b)
    f = _mm(h2, wfc) + bfc[0]
    f = f * jax.nn.sigmoid(1.702 * f)
    return x + _mm(f, wproj) + bproj[0]


def reference_forward(x_lnd, layer_params, H):
    x = jnp.transpose(x_lnd, (1, 0, 2))
    for p in layer_params:
        x = reference_block(x, p, H)
    return jnp.transpose(x, (1, 0, 2))


# --------------------------------- main ------------------------------------ #

if __name__ == "__main__":
    width, layers, heads = 32, 2, 4
    L, B = 8, 4          # seq length, batch (B=4 -> batch tile TB=4 exercised)

    key = jax.random.PRNGKey(0)
    kx, kp = jax.random.split(key)
    layer_keys = jax.random.split(kp, layers)
    layer_params = [make_layer_params(layer_keys[i], width, layers)
                    for i in range(layers)]
    packed = pack_params(layer_params, heads)

    x = jax.random.normal(kx, (L, B, width), jnp.float32)   # (L, N, D) seq-first

    out = jax.block_until_ready(transformer_forward(x, packed, heads))
    ref = jax.block_until_ready(reference_forward(x, layer_params, heads))

    assert out.shape == (L, B, width)
    assert jnp.allclose(out, ref, atol=1e-2, rtol=1e-2), "mismatch vs reference"
    print("KERNEL_OK")
</pallas_src>

<mosaic_0001>
module attributes {stable_mosaic.version = 11 : i64} {
  func.func @transformer_kernel(%arg0: i32, %arg1: i32, %arg2: memref<4x8x32xf32, #tpu.memory_space<vmem>>, %arg3: memref<1x1x32xf32, #tpu.memory_space<vmem>>, %arg4: memref<1x1x32xf32, #tpu.memory_space<vmem>>, %arg5: memref<1x32x96xbf16, #tpu.memory_space<vmem>>, %arg6: memref<1x1x96xf32, #tpu.memory_space<vmem>>, %arg7: memref<1x32x32xbf16, #tpu.memory_space<vmem>>, %arg8: memref<1x1x32xf32, #tpu.memory_space<vmem>>, %arg9: memref<1x1x32xf32, #tpu.memory_space<vmem>>, %arg10: memref<1x1x32xf32, #tpu.memory_space<vmem>>, %arg11: memref<1x32x128xbf16, #tpu.memory_space<vmem>>, %arg12: memref<1x1x128xf32, #tpu.memory_space<vmem>>, %arg13: memref<1x128x32xbf16, #tpu.memory_space<vmem>>, %arg14: memref<1x1x32xf32, #tpu.memory_space<vmem>>, %arg15: memref<4x8x32xf32, #tpu.memory_space<vmem>>, %arg16: memref<4x8x32xf32, #tpu.memory_space<vmem>>) attributes {dimension_semantics = [#tpu.dimension_semantics<parallel>, #tpu.dimension_semantics<arbitrary>], iteration_bounds = array<i64: 1, 2>, scalar_prefetch = 0 : i64, scratch_operands = 1 : i64, tpu.core_type = #tpu.core_type<tc>, window_params = [{transform_indices = @transform_0, window_bounds = array<i64: 4, 8, 32>}, {transform_indices = @transform_1, window_bounds = array<i64: 1, 1, 32>}, {transform_indices = @transform_2, window_bounds = array<i64: 1, 1, 32>}, {transform_indices = @transform_3, window_bounds = array<i64: 1, 32, 96>}, {transform_indices = @transform_4, window_bounds = array<i64: 1, 1, 96>}, {transform_indices = @transform_5, window_bounds = array<i64: 1, 32, 32>}, {transform_indices = @transform_6, window_bounds = array<i64: 1, 1, 32>}, {transform_indices = @transform_7, window_bounds = array<i64: 1, 1, 32>}, {transform_indices = @transform_8, window_bounds = array<i64: 1, 1, 32>}, {transform_indices = @transform_9, window_bounds = array<i64: 1, 32, 128>}, {transform_indices = @transform_10, window_bounds = array<i64: 1, 1, 128>}, {transform_indices = @transform_11, window_bounds = array<i64: 1, 128, 32>}, {transform_indices = @transform_12, window_bounds = array<i64: 1, 1, 32>}, {transform_indices = @transform_13, window_bounds = array<i64: 4, 8, 32>}]} {
    %c0_i32 = arith.constant 0 : i32
    %0 = arith.cmpi eq, %arg1, %c0_i32 : i32
    %1 = arith.extui %0 : i1 to i32
    %c0_i32_0 = arith.constant 0 : i32
    %2 = arith.cmpi ne, %1, %c0_i32_0 : i32
    scf.if %2 {
      %c0_85 = arith.constant 0 : index
      %c0_86 = arith.constant 0 : index
      %c0_87 = arith.constant 0 : index
      %190 = vector.load %arg2[%c0_85, %c0_86, %c0_87] : memref<4x8x32xf32, #tpu.memory_space<vmem>>, vector<4x8x32xf32>
      %c0_88 = arith.constant 0 : index
      %c0_89 = arith.constant 0 : index
      %c0_90 = arith.constant 0 : index
      %191 = vector.load %arg15[%c0_88, %c0_89, %c0_90] : memref<4x8x32xf32, #tpu.memory_space<vmem>>, vector<4x8x32xf32>
      tpu.vector_store %arg15[%c0_88, %c0_89, %c0_90], %190 {strides = array<i32>} : memref<4x8x32xf32, #tpu.memory_space<vmem>>, vector<4x8x32xf32>,
    } else {
    }
    %c0 = arith.constant 0 : index
    %c0_1 = arith.constant 0 : index
    %c0_2 = arith.constant 0 : index
    %3 = vector.load %arg15[%c0, %c0_1, %c0_2] : memref<4x8x32xf32, #tpu.memory_space<vmem>>, vector<4x8x32xf32>
    %c0_3 = arith.constant 0 : index
    %c0_4 = arith.constant 0 : index
    %c0_5 = arith.constant 0 : index
    %4 = vector.load %arg3[%c0_3, %c0_4, %c0_5] : memref<1x1x32xf32, #tpu.memory_space<vmem>>, vector<1x1x32xf32>
    %5 = vector.shape_cast %4 : vector<1x1x32xf32> to vector<1x32xf32>
    %c0_6 = arith.constant 0 : index
    %c0_7 = arith.constant 0 : index
    %c0_8 = arith.constant 0 : index
    %6 = vector.load %arg4[%c0_6, %c0_7, %c0_8] : memref<1x1x32xf32, #tpu.memory_space<vmem>>, vector<1x1x32xf32>
    %7 = vector.shape_cast %6 : vector<1x1x32xf32> to vector<1x32xf32>
    %cst = arith.constant dense<0.000000e+00> : vector<4x8xf32>
    %8 = vector.multi_reduction <add>, %3, %cst [2] : vector<4x8x32xf32> to vector<4x8xf32>
    %9 = vector.shape_cast %8 : vector<4x8xf32> to vector<4x8x1xf32>
    %cst_9 = arith.constant 3.200000e+01 : f32
    %10 = vector.broadcast %cst_9 : f32 to vector<4x8x1xf32>
    %11 = arith.divf %9, %10 : vector<4x8x1xf32>
    %12 = vector.broadcast %11 : vector<4x8x1xf32> to vector<4x8x32xf32>
    %13 = arith.subf %3, %12 : vector<4x8x32xf32>
    %14 = arith.mulf %13, %13 : vector<4x8x32xf32>
    %cst_10 = arith.constant dense<0.000000e+00> : vector<4x8xf32>
    %15 = vector.multi_reduction <add>, %14, %cst_10 [2] : vector<4x8x32xf32> to vector<4x8xf32>
    %16 = vector.shape_cast %15 : vector<4x8xf32> to vector<4x8x1xf32>
    %cst_11 = arith.constant 3.200000e+01 : f32
    %17 = vector.broadcast %cst_11 : f32 to vector<4x8x1xf32>
    %18 = arith.divf %16, %17 : vector<4x8x1xf32>
    %19 = vector.broadcast %11 : vector<4x8x1xf32> to vector<4x8x32xf32>
    %20 = arith.subf %3, %19 : vector<4x8x32xf32>
    %cst_12 = arith.constant 9.99999974E-6 : f32
    %21 = vector.broadcast %cst_12 : f32 to vector<4x8x1xf32>
    %22 = arith.addf %18, %21 : vector<4x8x1xf32>
    %23 = math.rsqrt %22 : vector<4x8x1xf32>
    %24 = vector.broadcast %23 : vector<4x8x1xf32> to vector<4x8x32xf32>
    %25 = arith.mulf %20, %24 : vector<4x8x32xf32>
    %26 = vector.shape_cast %5 : vector<1x32xf32> to vector<1x1x32xf32>
    %27 = vector.broadcast %26 : vector<1x1x32xf32> to vector<4x8x32xf32>
    %28 = arith.mulf %25, %27 : vector<4x8x32xf32>
    %29 = vector.shape_cast %7 : vector<1x32xf32> to vector<1x1x32xf32>
    %30 = vector.broadcast %29 : vector<1x1x32xf32> to vector<4x8x32xf32>
    %31 = arith.addf %28, %30 : vector<4x8x32xf32>
    %32 = vector.shape_cast %31 : vector<4x8x32xf32> to vector<32x32xf32>
    %33 = arith.truncf %32 : vector<32x32xf32> to vector<32x32xbf16>
    %c0_13 = arith.constant 0 : index
    %c0_14 = arith.constant 0 : index
    %c0_15 = arith.constant 0 : index
    %34 = vector.load %arg5[%c0_13, %c0_14, %c0_15] : memref<1x32x96xbf16, #tpu.memory_space<vmem>>, vector<1x32x96xbf16>
    %35 = vector.shape_cast %34 : vector<1x32x96xbf16> to vector<32x96xbf16>
    %cst_16 = arith.constant dense<0.000000e+00> : vector<32x96xf32>
    %36 = tpu.matmul %33, %35, %cst_16 {dimension_numbers = #tpu.dot_dimension_numbers<[1], [0], [0], [1], [0, 0, 1, 1], [], []>} : vector<32x32xbf16>, vector<32x96xbf16>, vector<32x96xf32> -> vector<32x96xf32>
    %c0_17 = arith.constant 0 : index
    %c0_18 = arith.constant 0 : index
    %c0_19 = arith.constant 0 : index
    %37 = vector.load %arg6[%c0_17, %c0_18, %c0_19] : memref<1x1x96xf32, #tpu.memory_space<vmem>>, vector<1x1x96xf32>
    %38 = vector.shape_cast %37 : vector<1x1x96xf32> to vector<1x96xf32>
    %39 = vector.broadcast %38 : vector<1x96xf32> to vector<32x96xf32>
    %40 = arith.addf %36, %39 : vector<32x96xf32>
    %41 = vector.shape_cast %40 : vector<32x96xf32> to vector<4x8x96xf32>
    %42 = vector.extract_strided_slice %41 {offsets = [0, 0, 0], sizes = [4, 8, 8], strides = [1, 1, 1]} : vector<4x8x96xf32> to vector<4x8x8xf32>
    %43 = arith.truncf %42 : vector<4x8x8xf32> to vector<4x8x8xbf16>
    %44 = vector.extract_strided_slice %41 {offsets = [0, 0, 32], sizes = [4, 8, 8], strides = [1, 1, 1]} : vector<4x8x96xf32> to vector<4x8x8xf32>
    %45 = arith.truncf %44 : vector<4x8x8xf32> to vector<4x8x8xbf16>
    %46 = vector.extract_strided_slice %41 {offsets = [0, 0, 64], sizes = [4, 8, 8], strides = [1, 1, 1]} : vector<4x8x96xf32> to vector<4x8x8xf32>
    %47 = arith.truncf %46 : vector<4x8x8xf32> to vector<4x8x8xbf16>
    "tpu.trace_start"() <{level = 10 : i32, message = "bld,bmd->blm"}> : () -> ()
    %cst_20 = arith.constant dense<0.000000e+00> : vector<4x8x8xf32>
    %48 = tpu.matmul %43, %45, %cst_20 {dimension_numbers = #tpu.dot_dimension_numbers<[2], [2], [1], [1], [0, 0, 0, 1, 1, 1], [0], [0]>} : vector<4x8x8xbf16>, vector<4x8x8xbf16>, vector<4x8x8xf32> -> vector<4x8x8xf32>
    "tpu.trace_stop"() : () -> ()
    %cst_21 = arith.constant dense<0xFF800000> : vector<4x8xf32>
    %49 = vector.multi_reduction <maximumf>, %48, %cst_21 [2] : vector<4x8x8xf32> to vector<4x8xf32>
    %50 = vector.shape_cast %49 : vector<4x8xf32> to vector<4x8x1xf32>
    %51 = vector.broadcast %50 : vector<4x8x1xf32> to vector<4x8x8xf32>
    %52 = arith.subf %48, %51 : vector<4x8x8xf32>
    %53 = math.exp %52 : vector<4x8x8xf32>
    %cst_22 = arith.constant dense<0.000000e+00> : vector<4x8xf32>
    %54 = vector.multi_reduction <add>, %53, %cst_22 [2] : vector<4x8x8xf32> to vector<4x8xf32>
    %55 = vector.shape_cast %54 : vector<4x8xf32> to vector<4x8x1xf32>
    %56 = tpu.reciprocal %55 {approx = true} : vector<4x8x1xf32> -> vector<4x8x1xf32>
    %57 = vector.broadcast %56 : vector<4x8x1xf32> to vector<4x8x8xf32>
    %58 = arith.mulf %53, %57 : vector<4x8x8xf32>
    %59 = arith.truncf %58 : vector<4x8x8xf32> to vector<4x8x8xbf16>
    "tpu.trace_start"() <{level = 10 : i32, message = "blm,bmd->bld"}> : () -> ()
    %cst_23 = arith.constant dense<0.000000e+00> : vector<4x8x8xf32>
    %60 = tpu.matmul %59, %47, %cst_23 {dimension_numbers = #tpu.dot_dimension_numbers<[2], [1], [1], [2], [0, 0, 0, 1, 1, 2], [0], [0]>} : vector<4x8x8xbf16>, vector<4x8x8xbf16>, vector<4x8x8xf32> -> vector<4x8x8xf32>
    "tpu.trace_stop"() : () -> ()
    %c0_24 = arith.constant 0 : index
    %c0_25 = arith.constant 0 : index
    %c0_26 = arith.constant 0 : index
    %61 = vector.load %arg16[%c0_24, %c0_25, %c0_26] : memref<4x8x32xf32, #tpu.memory_space<vmem>>, vector<4x8x8xf32>
    tpu.vector_store %arg16[%c0_24, %c0_25, %c0_26], %60 {strides = array<i32>} : memref<4x8x32xf32, #tpu.memory_space<vmem>>, vector<4x8x8xf32>,
    %62 = vector.extract_strided_slice %41 {offsets = [0, 0, 8], sizes = [4, 8, 8], strides = [1, 1, 1]} : vector<4x8x96xf32> to vector<4x8x8xf32>
    %63 = arith.truncf %62 : vector<4x8x8xf32> to vector<4x8x8xbf16>
    %64 = vector.extract_strided_slice %41 {offsets = [0, 0, 40], sizes = [4, 8, 8], strides = [1, 1, 1]} : vector<4x8x96xf32> to vector<4x8x8xf32>
    %65 = arith.truncf %64 : vector<4x8x8xf32> to vector<4x8x8xbf16>
    %66 = vector.extract_strided_slice %41 {offsets = [0, 0, 72], sizes = [4, 8, 8], strides = [1, 1, 1]} : vector<4x8x96xf32> to vector<4x8x8xf32>
    %67 = arith.truncf %66 : vector<4x8x8xf32> to vector<4x8x8xbf16>
    "tpu.trace_start"() <{level = 10 : i32, message = "bld,bmd->blm"}> : () -> ()
    %cst_27 = arith.constant dense<0.000000e+00> : vector<4x8x8xf32>
    %68 = tpu.matmul %63, %65, %cst_27 {dimension_numbers = #tpu.dot_dimension_numbers<[2], [2], [1], [1], [0, 0, 0, 1, 1, 1], [0], [0]>} : vector<4x8x8xbf16>, vector<4x8x8xbf16>, vector<4x8x8xf32> -> vector<4x8x8xf32>
    "tpu.trace_stop"() : () -> ()
    %cst_28 = arith.constant dense<0xFF800000> : vector<4x8xf32>
    %69 = vector.multi_reduction <maximumf>, %68, %cst_28 [2] : vector<4x8x8xf32> to vector<4x8xf32>
    %70 = vector.shape_cast %69 : vector<4x8xf32> to vector<4x8x1xf32>
    %71 = vector.broadcast %70 : vector<4x8x1xf32> to vector<4x8x8xf32>
    %72 = arith.subf %68, %71 : vector<4x8x8xf32>
    %73 = math.exp %72 : vector<4x8x8xf32>
    %cst_29 = arith.constant dense<0.000000e+00> : vector<4x8xf32>
    %74 = vector.multi_reduction <add>, %73, %cst_29 [2] : vector<4x8x8xf32> to vector<4x8xf32>
    %75 = vector.shape_cast %74 : vector<4x8xf32> to vector<4x8x1xf32>
    %76 = tpu.reciprocal %75 {approx = true} : vector<4x8x1xf32> -> vector<4x8x1xf32>
    %77 = vector.broadcast %76 : vector<4x8x1xf32> to vector<4x8x8xf32>
    %78 = arith.mulf %73, %77 : vector<4x8x8xf32>
    %79 = arith.truncf %78 : vector<4x8x8xf32> to vector<4x8x8xbf16>
    "tpu.trace_start"() <{level = 10 : i32, message = "blm,bmd->bld"}> : () -> ()
    %cst_30 = arith.constant dense<0.000000e+00> : vector<4x8x8xf32>
    %80 = tpu.matmul %79, %67, %cst_30 {dimension_numbers = #tpu.dot_dimension_numbers<[2], [1], [1], [2], [0, 0, 0, 1, 1, 2], [0], [0]>} : vector<4x8x8xbf16>, vector<4x8x8xbf16>, vector<4x8x8xf32> -> vector<4x8x8xf32>
    "tpu.trace_stop"() : () -> ()
    %c0_31 = arith.constant 0 : index
    %c0_32 = arith.constant 0 : index
    %c8 = arith.constant 8 : index
    %81 = vector.load %arg16[%c0_31, %c0_32, %c8] : memref<4x8x32xf32, #tpu.memory_space<vmem>>, vector<4x8x8xf32>
    tpu.vector_store %arg16[%c0_31, %c0_32, %c8], %80 {strides = array<i32>} : memref<4x8x32xf32, #tpu.memory_space<vmem>>, vector<4x8x8xf32>,
    %82 = vector.extract_strided_slice %41 {offsets = [0, 0, 16], sizes = [4, 8, 8], strides = [1, 1, 1]} : vector<4x8x96xf32> to vector<4x8x8xf32>
    %83 = arith.truncf %82 : vector<4x8x8xf32> to vector<4x8x8xbf16>
    %84 = vector.extract_strided_slice %41 {offsets = [0, 0, 48], sizes = [4, 8, 8], strides = [1, 1, 1]} : vector<4x8x96xf32> to vector<4x8x8xf32>
    %85 = arith.truncf %84 : vector<4x8x8xf32> to vector<4x8x8xbf16>
    %86 = vector.extract_strided_slice %41 {offsets = [0, 0, 80], sizes = [4, 8, 8], strides = [1, 1, 1]} : vector<4x8x96xf32> to vector<4x8x8xf32>
    %87 = arith.truncf %86 : vector<4x8x8xf32> to vector<4x8x8xbf16>
    "tpu.trace_start"() <{level = 10 : i32, message = "bld,bmd->blm"}> : () -> ()
    %cst_33 = arith.constant dense<0.000000e+00> : vector<4x8x8xf32>
    %88 = tpu.matmul %83, %85, %cst_33 {dimension_numbers = #tpu.dot_dimension_numbers<[2], [2], [1], [1], [0, 0, 0, 1, 1, 1], [0], [0]>} : vector<4x8x8xbf16>, vector<4x8x8xbf16>, vector<4x8x8xf32> -> vector<4x8x8xf32>
    "tpu.trace_stop"() : () -> ()
    %cst_34 = arith.constant dense<0xFF800000> : vector<4x8xf32>
    %89 = vector.multi_reduction <maximumf>, %88, %cst_34 [2] : vector<4x8x8xf32> to vector<4x8xf32>
    %90 = vector.shape_cast %89 : vector<4x8xf32> to vector<4x8x1xf32>
    %91 = vector.broadcast %90 : vector<4x8x1xf32> to vector<4x8x8xf32>
    %92 = arith.subf %88, %91 : vector<4x8x8xf32>
    %93 = math.exp %92 : vector<4x8x8xf32>
    %cst_35 = arith.constant dense<0.000000e+00> : vector<4x8xf32>
    %94 = vector.multi_reduction <add>, %93, %cst_35 [2] : vector<4x8x8xf32> to vector<4x8xf32>
    %95 = vector.shape_cast %94 : vector<4x8xf32> to vector<4x8x1xf32>
    %96 = tpu.reciprocal %95 {approx = true} : vector<4x8x1xf32> -> vector<4x8x1xf32>
    %97 = vector.broadcast %96 : vector<4x8x1xf32> to vector<4x8x8xf32>
    %98 = arith.mulf %93, %97 : vector<4x8x8xf32>
    %99 = arith.truncf %98 : vector<4x8x8xf32> to vector<4x8x8xbf16>
    "tpu.trace_start"() <{level = 10 : i32, message = "blm,bmd->bld"}> : () -> ()
    %cst_36 = arith.constant dense<0.000000e+00> : vector<4x8x8xf32>
    %100 = tpu.matmul %99, %87, %cst_36 {dimension_numbers = #tpu.dot_dimension_numbers<[2], [1], [1], [2], [0, 0, 0, 1, 1, 2], [0], [0]>} : vector<4x8x8xbf16>, vector<4x8x8xbf16>, vector<4x8x8xf32> -> vector<4x8x8xf32>
    "tpu.trace_stop"() : () -> ()
    %c0_37 = arith.constant 0 : index
    %c0_38 = arith.constant 0 : index
    %c16 = arith.constant 16 : index
    %101 = vector.load %arg16[%c0_37, %c0_38, %c16] : memref<4x8x32xf32, #tpu.memory_space<vmem>>, vector<4x8x8xf32>
    tpu.vector_store %arg16[%c0_37, %c0_38, %c16], %100 {strides = array<i32>} : memref<4x8x32xf32, #tpu.memory_space<vmem>>, vector<4x8x8xf32>,
    %102 = vector.extract_strided_slice %41 {offsets = [0, 0, 24], sizes = [4, 8, 8], strides = [1, 1, 1]} : vector<4x8x96xf32> to vector<4x8x8xf32>
    %103 = arith.truncf %102 : vector<4x8x8xf32> to vector<4x8x8xbf16>
    %104 = vector.extract_strided_slice %41 {offsets = [0, 0, 56], sizes = [4, 8, 8], strides = [1, 1, 1]} : vector<4x8x96xf32> to vector<4x8x8xf32>
    %105 = arith.truncf %104 : vector<4x8x8xf32> to vector<4x8x8xbf16>
    %106 = vector.extract_strided_slice %41 {offsets = [0, 0, 88], sizes = [4, 8, 8], strides = [1, 1, 1]} : vector<4x8x96xf32> to vector<4x8x8xf32>
    %107 = arith.truncf %106 : vector<4x8x8xf32> to vector<4x8x8xbf16>
    "tpu.trace_start"() <{level = 10 : i32, message = "bld,bmd->blm"}> : () -> ()
    %cst_39 = arith.constant dense<0.000000e+00> : vector<4x8x8xf32>
    %108 = tpu.matmul %103, %105, %cst_39 {dimension_numbers = #tpu.dot_dimension_numbers<[2], [2], [1], [1], [0, 0, 0, 1, 1, 1], [0], [0]>} : vector<4x8x8xbf16>, vector<4x8x8xbf16>, vector<4x8x8xf32> -> vector<4x8x8xf32>
    "tpu.trace_stop"() : () -> ()
    %cst_40 = arith.constant dense<0xFF800000> : vector<4x8xf32>
    %109 = vector.multi_reduction <maximumf>, %108, %cst_40 [2] : vector<4x8x8xf32> to vector<4x8xf32>
    %110 = vector.shape_cast %109 : vector<4x8xf32> to vector<4x8x1xf32>
    %111 = vector.broadcast %110 : vector<4x8x1xf32> to vector<4x8x8xf32>
    %112 = arith.subf %108, %111 : vector<4x8x8xf32>
    %113 = math.exp %112 : vector<4x8x8xf32>
    %cst_41 = arith.constant dense<0.000000e+00> : vector<4x8xf32>
    %114 = vector.multi_reduction <add>, %113, %cst_41 [2] : vector<4x8x8xf32> to vector<4x8xf32>
    %115 = vector.shape_cast %114 : vector<4x8xf32> to vector<4x8x1xf32>
    %116 = tpu.reciprocal %115 {approx = true} : vector<4x8x1xf32> -> vector<4x8x1xf32>
    %117 = vector.broadcast %116 : vector<4x8x1xf32> to vector<4x8x8xf32>
    %118 = arith.mulf %113, %117 : vector<4x8x8xf32>
    %119 = arith.truncf %118 : vector<4x8x8xf32> to vector<4x8x8xbf16>
    "tpu.trace_start"() <{level = 10 : i32, message = "blm,bmd->bld"}> : () -> ()
    %cst_42 = arith.constant dense<0.000000e+00> : vector<4x8x8xf32>
    %120 = tpu.matmul %119, %107, %cst_42 {dimension_numbers = #tpu.dot_dimension_numbers<[2], [1], [1], [2], [0, 0, 0, 1, 1, 2], [0], [0]>} : vector<4x8x8xbf16>, vector<4x8x8xbf16>, vector<4x8x8xf32> -> vector<4x8x8xf32>
    "tpu.trace_stop"() : () -> ()
    %c0_43 = arith.constant 0 : index
    %c0_44 = arith.constant 0 : index
    %c24 = arith.constant 24 : index
    %121 = vector.load %arg16[%c0_43, %c0_44, %c24] : memref<4x8x32xf32, #tpu.memory_space<vmem>>, vector<4x8x8xf32>
    tpu.vector_store %arg16[%c0_43, %c0_44, %c24], %120 {strides = array<i32>} : memref<4x8x32xf32, #tpu.memory_space<vmem>>, vector<4x8x8xf32>,
    %c0_45 = arith.constant 0 : index
    %c0_46 = arith.constant 0 : index
    %c0_47 = arith.constant 0 : index
    %122 = vector.load %arg16[%c0_45, %c0_46, %c0_47] : memref<4x8x32xf32, #tpu.memory_space<vmem>>, vector<4x8x32xf32>
    %123 = vector.shape_cast %122 : vector<4x8x32xf32> to vector<32x32xf32>
    %124 = arith.truncf %123 : vector<32x32xf32> to vector<32x32xbf16>
    %c0_48 = arith.constant 0 : index
    %c0_49 = arith.constant 0 : index
    %c0_50 = arith.constant 0 : index
    %125 = vector.load %arg7[%c0_48, %c0_49, %c0_50] : memref<1x32x32xbf16, #tpu.memory_space<vmem>>, vector<1x32x32xbf16>
    %126 = vector.shape_cast %125 : vector<1x32x32xbf16> to vector<32x32xbf16>
    %cst_51 = arith.constant dense<0.000000e+00> : vector<32x32xf32>
    %127 = tpu.matmul %124, %126, %cst_51 {dimension_numbers = #tpu.dot_dimension_numbers<[1], [0], [0], [1], [0, 0, 1, 1], [], []>} : vector<32x32xbf16>, vector<32x32xbf16>, vector<32x32xf32> -> vector<32x32xf32>
    %c0_52 = arith.constant 0 : index
    %c0_53 = arith.constant 0 : index
    %c0_54 = arith.constant 0 : index
    %128 = vector.load %arg8[%c0_52, %c0_53, %c0_54] : memref<1x1x32xf32, #tpu.memory_space<vmem>>, vector<1x1x32xf32>
    %129 = vector.shape_cast %128 : vector<1x1x32xf32> to vector<1x32xf32>
    %130 = vector.broadcast %129 : vector<1x32xf32> to vector<32x32xf32>
    %131 = arith.addf %127, %130 : vector<32x32xf32>
    %132 = vector.shape_cast %131 : vector<32x32xf32> to vector<4x8x32xf32>
    %133 = arith.addf %3, %132 : vector<4x8x32xf32>
    %c0_55 = arith.constant 0 : index
    %c0_56 = arith.constant 0 : index
    %c0_57 = arith.constant 0 : index
    %134 = vector.load %arg9[%c0_55, %c0_56, %c0_57] : memref<1x1x32xf32, #tpu.memory_space<vmem>>, vector<1x1x32xf32>
    %135 = vector.shape_cast %134 : vector<1x1x32xf32> to vector<1x32xf32>
    %c0_58 = arith.constant 0 : index
    %c0_59 = arith.constant 0 : index
    %c0_60 = arith.constant 0 : index
    %136 = vector.load %arg10[%c0_58, %c0_59, %c0_60] : memref<1x1x32xf32, #tpu.memory_space<vmem>>, vector<1x1x32xf32>
    %137 = vector.shape_cast %136 : vector<1x1x32xf32> to vector<1x32xf32>
    %cst_61 = arith.constant dense<0.000000e+00> : vector<4x8xf32>
    %138 = vector.multi_reduction <add>, %133, %cst_61 [2] : vector<4x8x32xf32> to vector<4x8xf32>
    %139 = vector.shape_cast %138 : vector<4x8xf32> to vector<4x8x1xf32>
    %cst_62 = arith.constant 3.200000e+01 : f32
    %140 = vector.broadcast %cst_62 : f32 to vector<4x8x1xf32>
    %141 = arith.divf %139, %140 : vector<4x8x1xf32>
    %142 = vector.broadcast %141 : vector<4x8x1xf32> to vector<4x8x32xf32>
    %143 = arith.subf %133, %142 : vector<4x8x32xf32>
    %144 = arith.mulf %143, %143 : vector<4x8x32xf32>
    %cst_63 = arith.constant dense<0.000000e+00> : vector<4x8xf32>
    %145 = vector.multi_reduction <add>, %144, %cst_63 [2] : vector<4x8x32xf32> to vector<4x8xf32>
    %146 = vector.shape_cast %145 : vector<4x8xf32> to vector<4x8x1xf32>
    %cst_64 = arith.constant 3.200000e+01 : f32
    %147 = vector.broadcast %cst_64 : f32 to vector<4x8x1xf32>
    %148 = arith.divf %146, %147 : vector<4x8x1xf32>
    %149 = vector.broadcast %141 : vector<4x8x1xf32> to vector<4x8x32xf32>
    %150 = arith.subf %133, %149 : vector<4x8x32xf32>
    %cst_65 = arith.constant 9.99999974E-6 : f32
    %151 = vector.broadcast %cst_65 : f32 to vector<4x8x1xf32>
    %152 = arith.addf %148, %151 : vector<4x8x1xf32>
    %153 = math.rsqrt %152 : vector<4x8x1xf32>
    %154 = vector.broadcast %153 : vector<4x8x1xf32> to vector<4x8x32xf32>
    %155 = arith.mulf %150, %154 : vector<4x8x32xf32>
    %156 = vector.shape_cast %135 : vector<1x32xf32> to vector<1x1x32xf32>
    %157 = vector.broadcast %156 : vector<1x1x32xf32> to vector<4x8x32xf32>
    %158 = arith.mulf %155, %157 : vector<4x8x32xf32>
    %159 = vector.shape_cast %137 : vector<1x32xf32> to vector<1x1x32xf32>
    %160 = vector.broadcast %159 : vector<1x1x32xf32> to vector<4x8x32xf32>
    %161 = arith.addf %158, %160 : vector<4x8x32xf32>
    %162 = vector.shape_cast %161 : vector<4x8x32xf32> to vector<32x32xf32>
    %163 = arith.truncf %162 : vector<32x32xf32> to vector<32x32xbf16>
    %c0_66 = arith.constant 0 : index
    %c0_67 = arith.constant 0 : index
    %c0_68 = arith.constant 0 : index
    %164 = vector.load %arg11[%c0_66, %c0_67, %c0_68] : memref<1x32x128xbf16, #tpu.memory_space<vmem>>, vector<1x32x128xbf16>
    %165 = vector.shape_cast %164 : vector<1x32x128xbf16> to vector<32x128xbf16>
    %cst_69 = arith.constant dense<0.000000e+00> : vector<32x128xf32>
    %166 = tpu.matmul %163, %165, %cst_69 {dimension_numbers = #tpu.dot_dimension_numbers<[1], [0], [0], [1], [0, 0, 1, 1], [], []>} : vector<32x32xbf16>, vector<32x128xbf16>, vector<32x128xf32> -> vector<32x128xf32>
    %c0_70 = arith.constant 0 : index
    %c0_71 = arith.constant 0 : index
    %c0_72 = arith.constant 0 : index
    %167 = vector.load %arg12[%c0_70, %c0_71, %c0_72] : memref<1x1x128xf32, #tpu.memory_space<vmem>>, vector<1x1x128xf32>
    %168 = vector.shape_cast %167 : vector<1x1x128xf32> to vector<1x128xf32>
    %169 = vector.broadcast %168 : vector<1x128xf32> to vector<32x128xf32>
    %170 = arith.addf %166, %169 : vector<32x128xf32>
    %cst_73 = arith.constant 1.702000e+00 : f32
    %171 = vector.broadcast %cst_73 : f32 to vector<32x128xf32>
    %172 = arith.mulf %171, %170 : vector<32x128xf32>
    %173 = arith.negf %172 : vector<32x128xf32>
    %174 = math.exp %173 : vector<32x128xf32>
    %cst_74 = arith.constant 1.000000e+00 : f32
    %175 = vector.broadcast %cst_74 : f32 to vector<32x128xf32>
    %176 = arith.addf %175, %174 : vector<32x128xf32>
    %177 = arith.divf %175, %176 : vector<32x128xf32>
    %178 = arith.mulf %170, %177 : vector<32x128xf32>
    %179 = arith.truncf %178 : vector<32x128xf32> to vector<32x128xbf16>
    %c0_75 = arith.constant 0 : index
    %c0_76 = arith.constant 0 : index
    %c0_77 = arith.constant 0 : index
    %180 = vector.load %arg13[%c0_75, %c0_76, %c0_77] : memref<1x128x32xbf16, #tpu.memory_space<vmem>>, vector<1x128x32xbf16>
    %181 = vector.shape_cast %180 : vector<1x128x32xbf16> to vector<128x32xbf16>
    %cst_78 = arith.constant dense<0.000000e+00> : vector<32x32xf32>
    %182 = tpu.matmul %179, %181, %cst_78 {dimension_numbers = #tpu.dot_dimension_numbers<[1], [0], [0], [1], [0, 0, 1, 1], [], []>} : vector<32x128xbf16>, vector<128x32xbf16>, vector<32x32xf32> -> vector<32x32xf32>
    %c0_79 = arith.constant 0 : index
    %c0_80 = arith.constant 0 : index
    %c0_81 = arith.constant 0 : index
    %183 = vector.load %arg14[%c0_79, %c0_80, %c0_81] : memref<1x1x32xf32, #tpu.memory_space<vmem>>, vector<1x1x32xf32>
    %184 = vector.shape_cast %183 : vector<1x1x32xf32> to vector<1x32xf32>
    %185 = vector.broadcast %184 : vector<1x32xf32> to vector<32x32xf32>
    %186 = arith.addf %182, %185 : vector<32x32xf32>
    %187 = vector.shape_cast %186 : vector<32x32xf32> to vector<4x8x32xf32>
    %188 = arith.addf %133, %187 : vector<4x8x32xf32>
    %c0_82 = arith.constant 0 : index
    %c0_83 = arith.constant 0 : index
    %c0_84 = arith.constant 0 : index
    %189 = vector.load %arg15[%c0_82, %c0_83, %c0_84] : memref<4x8x32xf32, #tpu.memory_space<vmem>>, vector<4x8x32xf32>
    tpu.vector_store %arg15[%c0_82, %c0_83, %c0_84], %188 {strides = array<i32>} : memref<4x8x32xf32, #tpu.memory_space<vmem>>, vector<4x8x32xf32>,
    return
  }
  func.func @transform_0(%arg0: i32, %arg1: i32) -> (i32, i32, i32) {
    %c0_i32 = arith.constant 0 : i32
    %c0_i32_0 = arith.constant 0 : i32
    %c0_i32_1 = arith.constant 0 : i32
    return %arg0, %c0_i32, %c0_i32_0 : i32, i32, i32
  }
  func.func @transform_1(%arg0: i32, %arg1: i32) -> (i32, i32, i32) {
    %c0_i32 = arith.constant 0 : i32
    %c0_i32_0 = arith.constant 0 : i32
    %c0_i32_1 = arith.constant 0 : i32
    return %arg1, %c0_i32, %c0_i32_0 : i32, i32, i32
  }
  func.func @transform_2(%arg0: i32, %arg1: i32) -> (i32, i32, i32) {
    %c0_i32 = arith.constant 0 : i32
    %c0_i32_0 = arith.constant 0 : i32
    %c0_i32_1 = arith.constant 0 : i32
    return %arg1, %c0_i32, %c0_i32_0 : i32, i32, i32
  }
  func.func @transform_3(%arg0: i32, %arg1: i32) -> (i32, i32, i32) {
    %c0_i32 = arith.constant 0 : i32
    %c0_i32_0 = arith.constant 0 : i32
    %c0_i32_1 = arith.constant 0 : i32
    return %arg1, %c0_i32, %c0_i32_0 : i32, i32, i32
  }
  func.func @transform_4(%arg0: i32, %arg1: i32) -> (i32, i32, i32) {
    %c0_i32 = arith.constant 0 : i32
    %c0_i32_0 = arith.constant 0 : i32
    %c0_i32_1 = arith.constant 0 : i32
    return %arg1, %c0_i32, %c0_i32_0 : i32, i32, i32
  }
  func.func @transform_5(%arg0: i32, %arg1: i32) -> (i32, i32, i32) {
    %c0_i32 = arith.constant 0 : i32
    %c0_i32_0 = arith.constant 0 : i32
    %c0_i32_1 = arith.constant 0 : i32
    return %arg1, %c0_i32, %c0_i32_0 : i32, i32, i32
  }
  func.func @transform_6(%arg0: i32, %arg1: i32) -> (i32, i32, i32) {
    %c0_i32 = arith.constant 0 : i32
    %c0_i32_0 = arith.constant 0 : i32
    %c0_i32_1 = arith.constant 0 : i32
    return %arg1, %c0_i32, %c0_i32_0 : i32, i32, i32
  }
  func.func @transform_7(%arg0: i32, %arg1: i32) -> (i32, i32, i32) {
    %c0_i32 = arith.constant 0 : i32
    %c0_i32_0 = arith.constant 0 : i32
    %c0_i32_1 = arith.constant 0 : i32
    return %arg1, %c0_i32, %c0_i32_0 : i32, i32, i32
  }
  func.func @transform_8(%arg0: i32, %arg1: i32) -> (i32, i32, i32) {
    %c0_i32 = arith.constant 0 : i32
    %c0_i32_0 = arith.constant 0 : i32
    %c0_i32_1 = arith.constant 0 : i32
    return %arg1, %c0_i32, %c0_i32_0 : i32, i32, i32
  }
  func.func @transform_9(%arg0: i32, %arg1: i32) -> (i32, i32, i32) {
    %c0_i32 = arith.constant 0 : i32
    %c0_i32_0 = arith.constant 0 : i32
    %c0_i32_1 = arith.constant 0 : i32
    return %arg1, %c0_i32, %c0_i32_0 : i32, i32, i32
  }
  func.func @transform_10(%arg0: i32, %arg1: i32) -> (i32, i32, i32) {
    %c0_i32 = arith.constant 0 : i32
    %c0_i32_0 = arith.constant 0 : i32
    %c0_i32_1 = arith.constant 0 : i32
    return %arg1, %c0_i32, %c0_i32_0 : i32, i32, i32
  }
  func.func @transform_11(%arg0: i32, %arg1: i32) -> (i32, i32, i32) {
    %c0_i32 = arith.constant 0 : i32
    %c0_i32_0 = arith.constant 0 : i32
    %c0_i32_1 = arith.constant 0 : i32
    return %arg1, %c0_i32, %c0_i32_0 : i32, i32, i32
  }
  func.func @transform_12(%arg0: i32, %arg1: i32) -> (i32, i32, i32) {
    %c0_i32 = arith.constant 0 : i32
    %c0_i32_0 = arith.constant 0 : i32
    %c0_i32_1 = arith.constant 0 : i32
    return %arg1, %c0_i32, %c0_i32_0 : i32, i32, i32
  }
  func.func @transform_13(%arg0: i32, %arg1: i32) -> (i32, i32, i32) {
    %c0_i32 = arith.constant 0 : i32
    %c0_i32_0 = arith.constant 0 : i32
    %c0_i32_1 = arith.constant 0 : i32
    return %arg0, %c0_i32, %c0_i32_0 : i32, i32, i32
  }
}

</mosaic_0001>

<bundles_post_ra>
// kernel: tpu_custom_call.1
= control target key start
LH: loop header
LB: loop body
LE: loop exit
PB: predicated region body
PF: predicated region fallthrough
CT: control target
= control target key end

     0   :  { %s4441_s0 = inlined_call_operand.vmem [shape: f32[4,8,32], index: 0, kind: input, shape index: {}]   ;;  %s4442_s1 = inlined_call_operand.vmem [shape: f32[2,1,32], index: 1, kind: input, shape index: {}]   ;;  %s4443_s2 = inlined_call_operand.vmem [shape: f32[2,1,32], index: 2, kind: input, shape index: {}]   ;;  %s4444_s3 = inlined_call_operand.vmem [shape: bf16[2,32,96], index: 3, kind: input, shape index: {}]   ;;  %s4445_s4 = inlined_call_operand.vmem [shape: f32[2,1,96], index: 4, kind: input, shape index: {}]   ;;  %s4446_s5 = inlined_call_operand.vmem [shape: bf16[2,32,32], index: 5, kind: input, shape index: {}]   ;;  %s4447_s6 = inlined_call_operand.vmem [shape: f32[2,1,32], index: 6, kind: input, shape index: {}]   ;;  %s4448_s7 = inlined_call_operand.vmem [shape: f32[2,1,32], index: 7, kind: input, shape index: {}]   ;;  %s4449_s8 = inlined_call_operand.vmem [shape: f32[2,1,32], index: 8, kind: input, shape index: {}]   ;;  %s4450_s9 = inlined_call_operand.vmem [shape: bf16[2,32,128], index: 9, kind: input, shape index: {}]   ;;  %s4451_s10 = inlined_call_operand.vmem [shape: f32[2,1,128], index: 10, kind: input, shape index: {}]   ;;  %s4452_s11 = inlined_call_operand.vmem [shape: bf16[2,128,32], index: 11, kind: input, shape index: {}]   ;;  %s4453_s12 = inlined_call_operand.vmem [shape: f32[2,1,32], index: 12, kind: input, shape index: {}]   ;;  %s4454_s13 = inlined_call_operand.hbm [shape: f32[4,8,32], index: 13, kind: output, shape index: {}]  }
   0x1   :  { %4458 = sst [smem:[#allocation10_spill]] %s4444_s3 }
   0x2   :  { %4459 = sst [smem:[#allocation11_spill]] %s4446_s5 }
   0x3   :  { %4460 = sst [smem:[#allocation12_spill]] %s4454_s13 }
   0x4   :  { %18 = vsyncpa [#allocation4], 0  ;;  %s3941_s25 = smov 0   ;;  %s3943_s26 = smov 0  }
   0x5   :  { %s3945_s27 = smov 0  }
   0x6 LB: > { %4461 = sst [smem:[#allocation6_spill]] %s3847_s26  ;;  %s33_s29 = sadd.s32 1, %s3847_s26  ;;  %s3851_s27 = sphi %s3945_s27, %s24_s27   ;;  %s3847_s26 = sphi %s3943_s26, %s4478_s26   ;;  %s3843_s25 = sphi %s3941_s25, %s4477_s25  }
   0x7   : > { %4462 = sst [smem:[#allocation7_spill]] %s3851_s27  ;;  %p34_p0 = scmp.ge.s32.totalorder %s33_s29, 2 }
   0x8   : > { %p3235_p1 = scmp.ge.s32.totalorder %s3851_s27, 1  ;;  %p505_p2 = scmp.lt.s32.totalorder %s3851_s27, 3 }
   0x9   : > { %s4480_s29 = smov (%p34_p0, %s33_s29), 0 }
   0xa   : > { %4463 = sst [smem:[#allocation8_spill]] %s4480_s29  ;;  %p506_p3 = pnand %p3235_p1, %p505_p2 }
   0xc   : > { %509 = sbr.rel (%p506_p3) target bundleno = 4246 (0x1096), region = 72 }
  0x11   : > { %p594_p4 = scmp.lt.s32.totalorder %s3843_s25, 1  ;;  %s4464_s3 = sld [smem:[#allocation10_spill]] }
  0x12   : > { %s4465_s5 = sld [smem:[#allocation11_spill]]  ;;  %p3244_p5 = scmp.ne.s32.totalorder %s3843_s25, 0 }
  0x13   : > { %s3960_s30 = scalar_select %p594_p4, %s3843_s25, 1 }
  0x15   : > { %s3313_s20 = sshll.u32 %s3960_s30, 4  ;;  %s618_s27 = scalar_lea.vmem %s4448_s7, %s3960_s30 }
  0x16   : > { %s621_s23 = scalar_lea.vmem %s4449_s8, %s3960_s30  ;;  %s637_s21 = scalar_lea.vmem %s4453_s12, %s3960_s30 }
  0x17   : > { %s3978_s15 = scalar_lea.vmem %s4464_s3, %s3313_s20  ;;  %s4000_s3 = scalar_lea.vmem %s4450_s9, %s3313_s20 }
  0x18   : > { %s3983_s26 = scalar_lea.vmem %s4465_s5, %s3313_s20  ;;  %s629_s5 = scalar_lea.vmem %s4451_s10, %s3960_s30 }
  0x19   : > { %4466 = sst [smem:[#allocation9_spill]] %s3983_s26  ;;  %s3316_s26 = sshll.u32 %s3960_s30, 6 }
  0x1a   : > { %s4010_s17 = scalar_lea.vmem %s4452_s11, %s3316_s26  ;;  %643 = sbr.rel (%p3244_p5) target bundleno = 34 (0x22), region = 76 }
  0x1f   : > { %v644_v0 = vld [vmem:[%s4441_s0] sm:$0xff]  ;;  %vm648_vm0 = vcmask 261120   ;;  %v645_v1 = vld [vmem:[%s4441_s0 + $0x8] sm:$0xff]  ;;  %v646_v2 = vld [vmem:[%s4441_s0 + $0x10] sm:$0xff] }
  0x20   : > { %649 = vst.msk [vmem:[#allocation3] sm:$0xff] %vm648_vm0, %v644_v0  ;;  %650 = vst.msk [vmem:[#allocation3 + $0x8] sm:$0xff] %vm648_vm0, %v645_v1  ;;  %v647_v3 = vld [vmem:[%s4441_s0 + $0x18] sm:$0xff] }
  0x21   : > { %651 = vst.msk [vmem:[#allocation3 + $0x10] sm:$0xff] %vm648_vm0, %v646_v2  ;;  %652 = vst.msk [vmem:[#allocation3 + $0x18] sm:$0xff] %vm648_vm0, %v647_v3 }
  0x22 PF: > { %vm659_vm1 = vcmask 261120   ;;  %v3687_v32 = vld [vmem:[%s3978_s15 + $0x8] sm:$0xff]   ;;  %v3688_v33 = vld [vmem:[%s3978_s15] sm:$0xff]   ;;  %s4467_s16 = scalar_lea.vmem %s4442_s1, %s3960_s30  ;;  %s4468_s22 = scalar_lea.vmem %s4443_s2, %s3960_s30  ;;  %v3853_v2 = vmov 0.0   ;;  %vm3854_vm2 = vmmov 0   ;;  %vm820_vm3 = vcmask 64512  }
  0x23   : > { %3403 = vmatprep.subr.bf16.mxu0 %v3687_v32  ;;  %v3245_v48 = vld [vmem:[%s4467_s16] ss:$0 sm:$0xff]  ;;  %3423 = vmatprep.subr.bf16.mxu1 %v3853_v2  ;;  %s4469_s14 = scalar_lea.vmem %s4445_s4, %s3960_s30  ;;  %s3855_s28 = smov 96   ;;  %vm1067_vm4 = vcmask 1043456   ;;  %vm1715_vm5 = vcmask 130112   ;;  %vm2176_vm6 = vcmask 195712  }
  0x24   : > { %3404 = vmatpush3.bf16.msra.mxu0 %v3687_v32  ;;  %v3246_v53 = vld [vmem:[%s4468_s22] ss:$0 sm:$0xff]  ;;  %3425 = vmatprep.mubr.msk.bf16.mxu1 %vm3854_vm2, %v3853_v2  ;;  %s3856_s29 = smov 64   ;;  %s3857_s26 = smov 88   ;;  %vm2637_vm7 = vcmask 261312  }
  0x25   : > { %3405 = vmatprep.subr.bf16.mxu0 %v3688_v33  ;;  %s3858_s13 = smov 120   ;;  %s3859_s25 = smov 56  }
  0x26   : > { %s3860_s15 = smov 80   ;;  %s3861_s16 = smov 112  }
  0x27   : > { %v653_v4 = vld [vmem:[#allocation3] sm:$0xff]  ;;  %v654_v6 = vld [vmem:[#allocation3 + $0x8] sm:$0xff]  ;;  %s3862_s19 = smov 48   ;;  %s3863_s18 = smov 72  }
  0x28   : > { %v655_v5 = vld [vmem:[#allocation3 + $0x10] sm:$0xff]  ;;  %v660_v7 = vsel %vm659_vm1, %v653_v4, 0.0  ;;  %v656_v9 = vld [vmem:[#allocation3 + $0x18] sm:$0xff]  ;;  %v663_v10 = vsel %vm659_vm1, %v654_v6, 0.0  ;;  %3406 = vmatpush3.bf16.msra.mxu0 %v3688_v33  ;;  %s3864_s22 = smov 104   ;;  %s3865_s24 = smov 40  }
  0x29   : > { %v666_v8 = vsel %vm659_vm1, %v655_v5, 0.0  ;;  %661 = vadd.xlane.f32.xlu0 %v660_v7  ;;  %v669_v11 = vsel %vm659_vm1, %v656_v9, 0.0  ;;  %3411 = vmatprep.subr.bf16.mxu0 %v3853_v2  ;;  %s3866_s20 = smov 8  }
  0x2a   : > { %667 = vadd.xlane.f32.xlu1 %v666_v8 }
  0x2d   : > { %664 = vadd.xlane.f32.xlu0 %v663_v10 }
  0x2e   : > { %670 = vadd.xlane.f32.xlu1 %v669_v11 }
  0xb2   : > { %v662_v12 = vpop.xlane.xlu0 %661 }
  0xb3   : > { %v668_v13 = vpop.xlane.xlu1 %667  ;;  %v673_v14 = vmul.f32 0.03125, %v662_v12 }
  0xb4   : > { %v675_v15 = vmul.f32 0.03125, %v668_v13 }
  0xb5   : > { %v677_v16 = vsub.f32 %v653_v4, %v673_v14  ;;  %v3247_v4 = vld [vmem:[%s4469_s14] ss:$0 sm:$0xff]  ;;  %s3867_s14 = smov 16  }
  0xb6   : > { %v679_v17 = vsub.f32 %v655_v5, %v675_v15  ;;  %v665_v18 = vpop.xlane.xlu0 %664 }
  0xb7   : > { %v671_v19 = vpop.xlane.xlu1 %670  ;;  %v674_v20 = vmul.f32 0.03125, %v665_v18  ;;  %v681_v22 = vmul.f32 %v677_v16, %v677_v16 }
  0xb8   : > { %v676_v21 = vmul.f32 0.03125, %v671_v19  ;;  %v683_v23 = vmul.f32 %v679_v17, %v679_v17 }
  0xb9   : > { %v678_v24 = vsub.f32 %v654_v6, %v674_v20  ;;  %v685_v26 = vsel %vm659_vm1, %v681_v22, 0.0 }
  0xba   : > { %v680_v25 = vsub.f32 %v656_v9, %v676_v21  ;;  %686 = vadd.xlane.f32.xlu0 %v685_v26  ;;  %v691_v27 = vsel %vm659_vm1, %v683_v23, 0.0 }
  0xbb   : > { %v682_v28 = vmul.f32 %v678_v24, %v678_v24 }
  0xbc   : > { %v684_v29 = vmul.f32 %v680_v25, %v680_v25 }
  0xbd   : > { %v688_v30 = vsel %vm659_vm1, %v682_v28, 0.0 }
  0xbe   : > { %692 = vadd.xlane.f32.xlu0 %v691_v27  ;;  %689 = vadd.xlane.f32.xlu1 %v688_v30  ;;  %v694_v31 = vsel %vm659_vm1, %v684_v29, 0.0 }
  0xc2   : > { %695 = vadd.xlane.f32.xlu1 %v694_v31 }
 0x143   : > { %v687_v34 = vpop.xlane.xlu0 %686 }
 0x144   : > { %v697_v35 = vmul.f32 0.03125, %v687_v34 }
 0x146   : > { %v701_v36 = vadd.f32 1e-05, %v697_v35 }
 0x147   : > { %v690_v37 = vpop.xlane.xlu1 %689  ;;  %v693_v38 = vpop.xlane.xlu0 %692 }
 0x148   : > { %3701 = vrsqrt.f32 %v701_v36  ;;  %v698_v39 = vmul.f32 0.03125, %v690_v37  ;;  %v699_v40 = vmul.f32 0.03125, %v693_v38 }
 0x14a   : > { %v702_v41 = vadd.f32 1e-05, %v698_v39  ;;  %v703_v42 = vadd.f32 1e-05, %v699_v40 }
 0x14b   : > { %v696_v43 = vpop.xlane.xlu1 %695 }
 0x14c   : > { %3703 = vrsqrt.f32 %v702_v41  ;;  %v700_v44 = vmul.f32 0.03125, %v696_v43 }
 0x14d   : > { %3705 = vrsqrt.f32 %v703_v42 }
 0x14e   : > { %v704_v45 = vadd.f32 1e-05, %v700_v44 }
 0x150   : > { %3707 = vrsqrt.f32 %v704_v45 }
 0x155   : > { %v3702_v46 = vpop.eup %3701 }
 0x156   : > { %v709_v47 = vmul.f32 %v3702_v46, %v677_v16 }
 0x158   : > { %v719_v52 = vmul.f32 %v3245_v48, %v709_v47 }
 0x159   : > { %v3704_v49 = vpop.eup %3703 }
 0x15a   : > { %v3706_v50 = vpop.eup %3705  ;;  %v710_v51 = vmul.f32 %v3704_v49, %v678_v24  ;;  %v729_v57 = vadd.f32 %v3246_v53, %v719_v52 }
 0x15b   : > { %v711_v54 = vmul.f32 %v3706_v50, %v679_v17 }
 0x15c   : > { %v720_v55 = vmul.f32 %v3245_v48, %v710_v51 }
 0x15d   : > { %v3708_v56 = vpop.eup %3707  ;;  %v721_v60 = vmul.f32 %v3245_v48, %v711_v54 }
 0x15e   : > { %v730_v58 = vadd.f32 %v3246_v53, %v720_v55  ;;  %v712_v59 = vmul.f32 %v3708_v56, %v680_v25 }
 0x15f   : > { %v731_v63 = vadd.f32 %v3246_v53, %v721_v60 }
 0x160   : > { %v733_v61 = vpack.c.bf16 %v730_v58, %v729_v57  ;;  %v722_v62 = vmul.f32 %v3245_v48, %v712_v59 }
 0x162   : > { %3407 = vmatprep.mubr.msk.bf16.mxu0 %vm659_vm1, %v733_v61  ;;  %v732_v0 = vadd.f32 %v3246_v53, %v722_v62 }
 0x164   : > { %v734_v1 = vpack.c.bf16 %v732_v0, %v731_v63 }
 0x166   : > { %3408 = vmatmul.mubr.msk.bf16.vlgmr.msra.gmra.mxu0 %vm659_vm1, %v734_v1 }
 0x167   : > { %3413 = vmatprep.mubr.msk.bf16.mxu0 %vm3854_vm2, %v3853_v2 }
 0x226   : > { %v3409_v3 = vpop.f32.mrf.mxu0 }
 0x227   : > { %v807_v11 = vadd.f32 %v3409_v3, %v3247_v4 }
 0x228   : > { %v798_v5 = vpop.f32.mrf.mxu0 }
 0x229   : > { %v799_v6 = vadd.f32 %v3247_v4, %v798_v5  ;;  %v4067_v13 = vpack.c.bf16 %v807_v11, %v807_v11 }
 0x22a   : > { %v3410_v7 = vpop.f32.mrf.mxu0 }
 0x22b   : > { %v4061_v8 = vpack.c.bf16 %v799_v6, %v799_v6  ;;  %v810_v14 = vadd.f32 %v3410_v7, %v3247_v4 }
 0x22c   : > { %v801_v9 = vpop.f32.mrf.mxu0 }
 0x22d   : > { %v802_v10 = vadd.f32 %v3247_v4, %v801_v9  ;;  %818 = vrot.lane.b32.xlu0 %v4061_v8, %s3855_s28  ;;  %v4070_v15 = vpack.c.bf16 %v810_v14, %v810_v14 }
 0x22f   : > { %v4064_v12 = vpack.c.bf16 %v802_v10, %v802_v10 }
 0x231   : > { %868 = vrot.lane.b32.xlu1 %v4064_v12, %s3855_s28 }
 0x235   : > { %917 = vrot.lane.b32.xlu1 %v4067_v13, %s3855_s28 }
 0x239   : > { %966 = vrot.lane.b32.xlu1 %v4070_v15, %s3855_s28  ;;  %s4470_s28 = sld [smem:[#allocation9_spill]] }
 0x29f   : > { %v819_v16 = vpop.permute.xlu0 %818 }
 0x2a0   : > { %v825_v17 = vsel %vm820_vm3, %v819_v16, 0 }
 0x2a1   : > { %3412 = vmatpush3.bf16.xpose.msra.mxu0 %v825_v17 }
 0x2a2   : > { %3417 = vmatprep.subr.bf16.mxu0 %v3853_v2 }
 0x2a3   : > { %v869_v18 = vpop.permute.xlu1 %868 }
 0x2a4   : > { %v874_v20 = vsel %vm820_vm3, %v869_v18, 0 }
 0x2a7   : > { %v918_v19 = vpop.permute.xlu1 %917 }
 0x2a8   : > { %3414 = vmatmul.mubr.msk.bf16.vlgmr.msra.gmra.mxu0 %vm820_vm3, %v4061_v8  ;;  %v923_v21 = vsel %vm820_vm3, %v918_v19, 0 }
 0x2a9   : > { %3418 = vmatpush3.bf16.xpose.msra.mxu0 %v874_v20  ;;  %3424 = vmatpush3.bf16.xpose.msra.mxu1 %v923_v21 }
 0x2aa   : > { %3419 = vmatprep.mubr.msk.bf16.mxu0 %vm3854_vm2, %v3853_v2  ;;  %3429 = vmatprep.subr.bf16.mxu0 %v3853_v2 }
 0x2ab   : > { %3435 = vmatprep.subr.bf16.mxu1 %v3853_v2  ;;  %v967_v22 = vpop.permute.xlu1 %966 }
 0x2ac   : > { %v972_v23 = vsel %vm820_vm3, %v967_v22, 0 }
 0x2b0   : > { %3420 = vmatmul.mubr.msk.bf16.vlgmr.msra.gmra.mxu0 %vm820_vm3, %v4064_v12  ;;  %3426 = vmatmul.mubr.msk.bf16.vlgmr.msra.gmra.mxu1 %vm820_vm3, %v4067_v13 }
 0x2b1   : > { %3430 = vmatpush3.bf16.xpose.msra.mxu0 %v972_v23  ;;  %3431 = vmatprep.mubr.msk.bf16.mxu0 %vm3854_vm2, %v3853_v2 }
 0x2b2   : > { %3441 = vmatprep.subr.bf16.mxu0 %v3853_v2  ;;  %3437 = vmatprep.mubr.msk.bf16.mxu1 %vm3854_vm2, %v3853_v2 }
 0x2b8   : > { %3432 = vmatmul.mubr.msk.bf16.vlgmr.msra.gmra.mxu0 %vm820_vm3, %v4070_v15 }
 0x2b9   : > { %3443 = vmatprep.mubr.msk.bf16.mxu0 %vm3854_vm2, %v3853_v2 }
 0x368   : > { %v861_v24 = vpop.f32.mrf.mxu0 }
 0x369   : > { %v1014_v25 = vsel %vm820_vm3, %v861_v24, -inf }
 0x36a   : > { %1015 = vmax.xlane.f32.xlu0 %v1014_v25  ;;  %v3415_v26 = vpop.f32.mrf.mxu0 }
 0x36c   : > { %v864_v27 = vpop.f32.mrf.mxu0 }
 0x36e   : > { %v3416_v28 = vpop.f32.mrf.mxu0 }
 0x370   : > { %v910_v29 = vpop.f32.mrf.mxu0  ;;  %v959_v30 = vpop.f32.mrf.mxu1 }
 0x371   : > { %v1020_v31 = vsel %vm820_vm3, %v959_v30, -inf  ;;  %v1017_v32 = vsel %vm820_vm3, %v910_v29, -inf }
 0x372   : > { %v3427_v33 = vpop.f32.mrf.mxu1  ;;  %1021 = vmax.xlane.f32.xlu0 %v1020_v31  ;;  %1018 = vmax.xlane.f32.xlu1 %v1017_v32  ;;  %v3421_v34 = vpop.f32.mrf.mxu0 }
 0x374   : > { %v913_v35 = vpop.f32.mrf.mxu0  ;;  %v962_v36 = vpop.f32.mrf.mxu1 }
 0x376   : > { %v3422_v37 = vpop.f32.mrf.mxu0  ;;  %v3428_v38 = vpop.f32.mrf.mxu1 }
 0x378   : > { %v1008_v39 = vpop.f32.mrf.mxu0 }
 0x379   : > { %v1023_v40 = vsel %vm820_vm3, %v1008_v39, -inf }
 0x37a   : > { %1024 = vmax.xlane.f32.xlu0 %v1023_v40  ;;  %v3433_v41 = vpop.f32.mrf.mxu0 }
 0x37c   : > { %v1011_v42 = vpop.f32.mrf.mxu0 }
 0x37e   : > { %v3434_v43 = vpop.f32.mrf.mxu0 }
 0x383   : > { %1111 = vrot.lane.b32.xlu1 %v4064_v12, %s3856_s29 }
 0x387   : > { %1159 = vrot.lane.b32.xlu1 %v4067_v13, %s3856_s29 }
 0x38b   : > { %1207 = vrot.lane.b32.xlu1 %v4070_v15, %s3856_s29 }
 0x3f3   : > { %v1016_v44 = vpop.xlane.xlu0 %1015 }
 0x3f4   : > { %v1026_v45 = vsub.f32 %v861_v24, %v1016_v44 }
 0x3f6   : > { %v1030_v50 = vmul.f32 1.442695, %v1026_v45 }
 0x3fb   : > { %v1022_v46 = vpop.xlane.xlu0 %1021  ;;  %v1019_v47 = vpop.xlane.xlu1 %1018 }
 0x3fc   : > { %v1028_v48 = vsub.f32 %v959_v30, %v1022_v46  ;;  %v1027_v49 = vsub.f32 %v910_v29, %v1019_v47 }
 0x3fe   : > { %v1034_v51 = vmul.f32 1.442695, %v1028_v48  ;;  %v1032_v52 = vmul.f32 1.442695, %v1027_v49 }
 0x3ff   : > { %v1112_v53 = vpop.permute.xlu1 %1111 }
 0x400   : > { %3709 = vpow2.f32 %v1034_v51  ;;  %v1117_v54 = vsel %vm1067_vm4, %v1112_v53, 0 }
 0x401   : > { %3711 = vpow2.f32 %v1032_v52  ;;  %3442 = vmatpush3.bf16.msra.mxu0 %v1117_v54 }
 0x402   : > { %3713 = vpow2.f32 %v1030_v50  ;;  %3453 = vmatprep.subr.bf16.mxu0 %v3853_v2 }
 0x403   : > { %v1025_v61 = vpop.xlane.xlu0 %1024  ;;  %v1160_v3 = vpop.permute.xlu1 %1159 }
 0x404   : > { %v1029_v62 = vsub.f32 %v1008_v39, %v1025_v61  ;;  %v1165_v22 = vsel %vm1067_vm4, %v1160_v3, 0 }
 0x406   : > { %v1036_v63 = vmul.f32 1.442695, %v1029_v62 }
 0x407   : > { %v1208_v4 = vpop.permute.xlu1 %1207 }
 0x408   : > { %3715 = vpow2.f32 %v1036_v63  ;;  %v1213_v19 = vsel %vm1067_vm4, %v1208_v4, 0 }
 0x40d   : > { %v3710_v55 = vpop.eup %3709 }
 0x40e   : > { %v3712_v56 = vpop.eup %3711  ;;  %v1044_v57 = vsel %vm820_vm3, %v3710_v55, 0.0 }
 0x40f   : > { %v3714_v58 = vpop.eup %3713  ;;  %v1041_v59 = vsel %vm820_vm3, %v3712_v56, 0.0  ;;  %1045 = vadd.xlane.f32.xlu0 %v1044_v57 }
 0x410   : > { %1042 = vadd.xlane.f32.xlu1 %v1041_v59  ;;  %v1038_v60 = vsel %vm820_vm3, %v3714_v58, 0.0 }
 0x413   : > { %1039 = vadd.xlane.f32.xlu0 %v1038_v60 }
 0x415   : > { %v3716_v0 = vpop.eup %3715 }
 0x416   : > { %v1047_v1 = vsel %vm820_vm3, %v3716_v0, 0.0 }
 0x421   : > { %1311 = vrot.lane.b32.xlu1 %v4064_v12, %s3857_s26 }
 0x429   : > { %1062 = vrot.lane.b32.xlu0 %v4061_v8, %s3856_s29  ;;  %s3868_s29 = smov 24  }
 0x42d   : > { %1261 = vrot.lane.b32.xlu0 %v4061_v8, %s3857_s26 }
 0x431   : > { %1259 = vrot.lane.b32.xlu0 %v4061_v8, %s3858_s13 }
 0x435   : > { %1361 = vrot.lane.b32.xlu0 %v4067_v13, %s3857_s26 }
 0x439   : > { %1359 = vrot.lane.b32.xlu0 %v4067_v13, %s3858_s13 }
 0x445   : > { %1048 = vadd.xlane.f32.xlu1 %v1047_v1 }
 0x456   : > { %1309 = vrot.lane.b32.xlu1 %v4064_v12, %s3858_s13 }
 0x45a   : > { %1411 = vrot.lane.b32.xlu1 %v4070_v15, %s3857_s26 }
 0x45e   : > { %1409 = vrot.lane.b32.xlu1 %v4070_v15, %s3858_s13 }
 0x498   : > { %v1046_v5 = vpop.xlane.xlu0 %1045 }
 0x499   : > { %v1043_v6 = vpop.xlane.xlu1 %1042 }
 0x49a   : > { %3717 = vrcp.f32 %v1043_v6 }
 0x49c   : > { %v1040_v7 = vpop.xlane.xlu0 %1039 }
 0x49d   : > { %3719 = vrcp.f32 %v1040_v7  ;;  %v1312_v31 = vpop.permute.xlu1 %1311 }
 0x49e   : > { %3721 = vrcp.f32 %v1046_v5  ;;  %v1317_v37 = vsel %vm820_vm3, %v1312_v31, 0 }
 0x4a0   : > { %v1063_v9 = vpop.permute.xlu0 %1062 }
 0x4a1   : > { %v1069_v10 = vsel %vm1067_vm4, %v1063_v9, 0 }
 0x4a2   : > { %3436 = vmatpush3.bf16.msra.mxu1 %v1069_v10 }
 0x4a3   : > { %3447 = vmatprep.subr.bf16.mxu1 %v3853_v2 }
 0x4a4   : > { %v1262_v23 = vpop.permute.xlu0 %1261 }
 0x4a5   : > { %v1267_v27 = vsel %vm820_vm3, %v1262_v23, 0 }
 0x4a7   : > { %v3718_v11 = vpop.eup %3717 }
 0x4a8   : > { %v1055_v14 = vmul.f32 %v3718_v11, %v3712_v56  ;;  %v1260_v26 = vpop.permute.xlu0 %1259 }
 0x4aa   : > { %v3720_v16 = vpop.eup %3719  ;;  %v1059_v17 = vpack.c.bf16 %v1055_v14, %v1055_v14 }
 0x4ab   : > { %v1054_v18 = vmul.f32 %v3720_v16, %v3714_v58  ;;  %v3722_v21 = vpop.eup %3721 }
 0x4ac   : > { %3444 = vmatmul.mubr.msk.bf16.vlgmr.msra.gmra.mxu0 %vm820_vm3, %v1059_v17  ;;  %v1056_v24 = vmul.f32 %v3722_v21, %v3710_v55  ;;  %v1362_v28 = vpop.permute.xlu0 %1361 }
 0x4ad   : > { %3454 = vmatpush3.bf16.msra.mxu0 %v1213_v19  ;;  %v1058_v20 = vpack.c.bf16 %v1054_v18, %v1054_v18  ;;  %3455 = vmatprep.mubr.msk.bf16.mxu0 %vm3854_vm2, %v3853_v2  ;;  %v1367_v29 = vsel %vm820_vm3, %v1362_v28, 0 }
 0x4ae   : > { %3465 = vmatprep.subr.bf16.mxu0 %v3853_v2  ;;  %v1060_v25 = vpack.c.bf16 %v1056_v24, %v1056_v24 }
 0x4af   : > { %3438 = vmatmul.mubr.msk.bf16.vlgmr.msra.gmra.mxu1 %vm820_vm3, %v1058_v20 }
 0x4b0   : > { %3448 = vmatpush3.bf16.msra.mxu1 %v1165_v22  ;;  %3449 = vmatprep.mubr.msk.bf16.mxu1 %vm3854_vm2, %v3853_v2  ;;  %v1360_v30 = vpop.permute.xlu0 %1359 }
 0x4b1   : > { %3459 = vmatprep.subr.bf16.mxu1 %v3853_v2 }
 0x4b7   : > { %3450 = vmatmul.mubr.msk.bf16.vlgmr.msra.gmra.mxu1 %vm820_vm3, %v1060_v25 }
 0x4b8   : > { %3460 = vmatpush3.bf16.xpose.msra.mxu1 %v1267_v27  ;;  %3461 = vmatprep.mubr.msk.bf16.mxu1 %vm3854_vm2, %v3853_v2 }
 0x4b9   : > { %3471 = vmatprep.subr.bf16.mxu1 %v3853_v2 }
 0x4bf   : > { %3462 = vmatmul.mubr.msk.bf16.vlgmr.msra.gmra.mxu1 %vm820_vm3, %v1260_v26 }
 0x4c0   : > { %3472 = vmatpush3.bf16.xpose.msra.mxu1 %v1367_v29  ;;  %3473 = vmatprep.mubr.msk.bf16.mxu1 %vm3854_vm2, %v3853_v2 }
 0x4c1   : > { %3483 = vmatprep.subr.bf16.mxu1 %v3853_v2 }
 0x4c7   : > { %3474 = vmatmul.mubr.msk.bf16.vlgmr.msra.gmra.mxu1 %vm820_vm3, %v1360_v30 }
 0x4c8   : > { %3485 = vmatprep.mubr.msk.bf16.mxu1 %vm3854_vm2, %v3853_v2 }
 0x4ce   : > { %v1049_v32 = vpop.xlane.xlu1 %1048 }
 0x4cf   : > { %3723 = vrcp.f32 %v1049_v32 }
 0x4d2   : > { %v1310_v36 = vpop.permute.xlu1 %1309 }
 0x4d6   : > { %v1412_v38 = vpop.permute.xlu1 %1411 }
 0x4d7   : > { %v1417_v39 = vsel %vm820_vm3, %v1412_v38, 0 }
 0x4da   : > { %v1410_v40 = vpop.permute.xlu1 %1409 }
 0x4dc   : > { %v3724_v33 = vpop.eup %3723 }
 0x4dd   : > { %v1057_v34 = vmul.f32 %v3724_v33, %v3716_v0 }
 0x4df   : > { %v1061_v35 = vpack.c.bf16 %v1057_v34, %v1057_v34 }
 0x4e1   : > { %3456 = vmatmul.mubr.msk.bf16.vlgmr.msra.gmra.mxu0 %vm820_vm3, %v1061_v35 }
 0x4e2   : > { %3466 = vmatpush3.bf16.xpose.msra.mxu0 %v1317_v37  ;;  %3467 = vmatprep.mubr.msk.bf16.mxu0 %vm3854_vm2, %v3853_v2 }
 0x4e3   : > { %3477 = vmatprep.subr.bf16.mxu0 %v3853_v2 }
 0x4e9   : > { %3468 = vmatmul.mubr.msk.bf16.vlgmr.msra.gmra.mxu0 %vm820_vm3, %v1310_v36 }
 0x4ea   : > { %3478 = vmatpush3.bf16.xpose.msra.mxu0 %v1417_v39  ;;  %3479 = vmatprep.mubr.msk.bf16.mxu0 %vm3854_vm2, %v3853_v2 }
 0x4eb   : > { %3489 = vmatprep.subr.bf16.mxu0 %v3853_v2 }
 0x4f1   : > { %3480 = vmatmul.mubr.msk.bf16.vlgmr.msra.gmra.mxu0 %vm820_vm3, %v1410_v40 }
 0x4f2   : > { %3491 = vmatprep.mubr.msk.bf16.mxu0 %vm3854_vm2, %v3853_v2 }
 0x56c   : > { %v1153_v41 = vpop.f32.mrf.mxu0 }
 0x56d   : > { %1256 = vst.msk [vmem:[#allocation2 + $0x8] sm:$0xff] %vm820_vm3, %v1153_v41 }
 0x56e   : > { %v3445_v42 = vpop.f32.mrf.mxu0 }
 0x56f   : > { %v1105_v43 = vpop.f32.mrf.mxu1 }
 0x570   : > { %1255 = vst.msk [vmem:[#allocation2] sm:$0xff] %vm820_vm3, %v1105_v43  ;;  %v1156_v44 = vpop.f32.mrf.mxu0 }
 0x571   : > { %v3439_v45 = vpop.f32.mrf.mxu1 }
 0x572   : > { %v3446_v46 = vpop.f32.mrf.mxu0 }
 0x573   : > { %v1108_v47 = vpop.f32.mrf.mxu1 }
 0x575   : > { %v3440_v48 = vpop.f32.mrf.mxu1 }
 0x577   : > { %v1201_v49 = vpop.f32.mrf.mxu1 }
 0x578   : > { %1257 = vst.msk [vmem:[#allocation2 + $0x10] sm:$0xff] %vm820_vm3, %v1201_v49 }
 0x579   : > { %v3451_v50 = vpop.f32.mrf.mxu1 }
 0x57b   : > { %v1204_v51 = vpop.f32.mrf.mxu1 }
 0x57d   : > { %v3452_v52 = vpop.f32.mrf.mxu1 }
 0x57f   : > { %v1303_v53 = vpop.f32.mrf.mxu1 }
 0x580   : > { %v1459_v54 = vsel %vm820_vm3, %v1303_v53, -inf }
 0x581   : > { %1460 = vmax.xlane.f32.xlu0 %v1459_v54  ;;  %v3463_v55 = vpop.f32.mrf.mxu1 }
 0x583   : > { %v1306_v56 = vpop.f32.mrf.mxu1 }
 0x585   : > { %v3464_v57 = vpop.f32.mrf.mxu1 }
 0x587   : > { %v1403_v58 = vpop.f32.mrf.mxu1 }
 0x588   : > { %v1465_v59 = vsel %vm820_vm3, %v1403_v58, -inf }
 0x589   : > { %1466 = vmax.xlane.f32.xlu0 %v1465_v59  ;;  %v3475_v60 = vpop.f32.mrf.mxu1 }
 0x58b   : > { %v1406_v61 = vpop.f32.mrf.mxu1 }
 0x58d   : > { %v3476_v62 = vpop.f32.mrf.mxu1 }
 0x5a1   : > { %v1249_v63 = vpop.f32.mrf.mxu0 }
 0x5a2   : > { %1258 = vst.msk [vmem:[#allocation2 + $0x18] sm:$0xff] %vm820_vm3, %v1249_v63 }
 0x5a3   : > { %v3457_v0 = vpop.f32.mrf.mxu0 }
 0x5a5   : > { %v1252_v1 = vpop.f32.mrf.mxu0 }
 0x5a7   : > { %v3458_v3 = vpop.f32.mrf.mxu0 }
 0x5a9   : > { %v1353_v4 = vpop.f32.mrf.mxu0 }
 0x5aa   : > { %v1462_v5 = vsel %vm820_vm3, %v1353_v4, -inf }
 0x5ab   : > { %1463 = vmax.xlane.f32.xlu1 %v1462_v5  ;;  %v3469_v6 = vpop.f32.mrf.mxu0 }
 0x5ad   : > { %v1356_v7 = vpop.f32.mrf.mxu0 }
 0x5af   : > { %v3470_v9 = vpop.f32.mrf.mxu0 }
 0x5b1   : > { %v1453_v10 = vpop.f32.mrf.mxu0 }
 0x5b2   : > { %v1468_v11 = vsel %vm820_vm3, %v1453_v10, -inf }
 0x5b3   : > { %1469 = vmax.xlane.f32.xlu0 %v1468_v11  ;;  %v3481_v14 = vpop.f32.mrf.mxu0 }
 0x5b5   : > { %v1456_v16 = vpop.f32.mrf.mxu0 }
 0x5b7   : > { %v3482_v17 = vpop.f32.mrf.mxu0 }
 0x5bc   : > { %1555 = vrot.lane.b32.xlu1 %v4064_v12, %s3859_s25 }
 0x5c0   : > { %1603 = vrot.lane.b32.xlu1 %v4067_v13, %s3859_s25 }
 0x5c4   : > { %1651 = vrot.lane.b32.xlu1 %v4070_v15, %s3859_s25 }
 0x60a   : > { %v1461_v18 = vpop.xlane.xlu0 %1460 }
 0x60b   : > { %v1471_v19 = vsub.f32 %v1303_v53, %v1461_v18 }
 0x60d   : > { %v1475_v20 = vmul.f32 1.442695, %v1471_v19 }
 0x60f   : > { %3725 = vpow2.f32 %v1475_v20 }
 0x612   : > { %v1467_v25 = vpop.xlane.xlu0 %1466 }
 0x613   : > { %v1473_v29 = vsub.f32 %v1403_v58, %v1467_v25 }
 0x615   : > { %v1479_v30 = vmul.f32 1.442695, %v1473_v29 }
 0x61c   : > { %v3726_v21 = vpop.eup %3725 }
 0x61d   : > { %v1483_v22 = vsel %vm820_vm3, %v3726_v21, 0.0 }
 0x61e   : > { %1484 = vadd.xlane.f32.xlu0 %v1483_v22 }
 0x634   : > { %v1464_v23 = vpop.xlane.xlu1 %1463  ;;  %1507 = vrot.lane.b32.xlu0 %v4061_v8, %s3859_s25  ;;  %s4471_s25 = scalar_lea.vmem %s4447_s6, %s3960_s30 }
 0x635   : > { %v1472_v24 = vsub.f32 %v1353_v4, %v1464_v23 }
 0x637   : > { %v1477_v26 = vmul.f32 1.442695, %v1472_v24 }
 0x638   : > { %v1556_v27 = vpop.permute.xlu1 %1555 }
 0x639   : > { %3727 = vpow2.f32 %v1477_v26  ;;  %v1561_v28 = vsel %vm1067_vm4, %v1556_v27, 0 }
 0x63a   : > { %3490 = vmatpush3.bf16.msra.mxu0 %v1561_v28  ;;  %3729 = vpow2.f32 %v1479_v30 }
 0x63b   : > { %3501 = vmatprep.subr.bf16.mxu0 %v3853_v2 }
 0x63c   : > { %v1470_v35 = vpop.xlane.xlu0 %1469  ;;  %v1604_v45 = vpop.permute.xlu1 %1603 }
 0x63d   : > { %v1474_v36 = vsub.f32 %v1453_v10, %v1470_v35  ;;  %v1609_v47 = vsel %vm1067_vm4, %v1604_v45, 0 }
 0x63f   : > { %v1481_v37 = vmul.f32 1.442695, %v1474_v36 }
 0x640   : > { %v1652_v48 = vpop.permute.xlu1 %1651 }
 0x641   : > { %3731 = vpow2.f32 %v1481_v37  ;;  %v1657_v54 = vsel %vm1067_vm4, %v1652_v48, 0 }
 0x646   : > { %v3728_v31 = vpop.eup %3727 }
 0x647   : > { %v1486_v32 = vsel %vm820_vm3, %v3728_v31, 0.0  ;;  %v3730_v33 = vpop.eup %3729 }
 0x648   : > { %1487 = vadd.xlane.f32.xlu1 %v1486_v32  ;;  %v1489_v34 = vsel %vm820_vm3, %v3730_v33, 0.0 }
 0x64e   : > { %v3732_v38 = vpop.eup %3731 }
 0x64f   : > { %v1492_v39 = vsel %vm820_vm3, %v3732_v38, 0.0 }
 0x653   : > { %1490 = vadd.xlane.f32.xlu0 %v1489_v34 }
 0x659   : > { %1772 = vrot.lane.b32.xlu1 %v4064_v12, %s3860_s15 }
 0x669   : > { %1722 = vrot.lane.b32.xlu0 %v4061_v8, %s3860_s15 }
 0x66d   : > { %1720 = vrot.lane.b32.xlu0 %v4061_v8, %s3861_s16 }
 0x671   : > { %1822 = vrot.lane.b32.xlu0 %v4067_v13, %s3860_s15 }
 0x675   : > { %1820 = vrot.lane.b32.xlu0 %v4067_v13, %s3861_s16 }
 0x67d   : > { %1493 = vadd.xlane.f32.xlu1 %v1492_v39 }
 0x68e   : > { %1770 = vrot.lane.b32.xlu1 %v4064_v12, %s3861_s16 }
 0x692   : > { %1872 = vrot.lane.b32.xlu1 %v4070_v15, %s3860_s15 }
 0x696   : > { %1870 = vrot.lane.b32.xlu1 %v4070_v15, %s3861_s16 }
 0x6a7   : > { %v1485_v40 = vpop.xlane.xlu0 %1484 }
 0x6a8   : > { %3733 = vrcp.f32 %v1485_v40 }
 0x6ab   : > { %v1508_v41 = vpop.permute.xlu0 %1507 }
 0x6ac   : > { %v1513_v42 = vsel %vm1067_vm4, %v1508_v41, 0 }
 0x6ad   : > { %3484 = vmatpush3.bf16.msra.mxu1 %v1513_v42 }
 0x6ae   : > { %3495 = vmatprep.subr.bf16.mxu1 %v3853_v2 }
 0x6b5   : > { %v3734_v43 = vpop.eup %3733 }
 0x6b6   : > { %v1499_v44 = vmul.f32 %v3734_v43, %v3726_v21 }
 0x6b8   : > { %v1503_v46 = vpack.c.bf16 %v1499_v44, %v1499_v44 }
 0x6ba   : > { %3486 = vmatmul.mubr.msk.bf16.vlgmr.msra.gmra.mxu1 %vm820_vm3, %v1503_v46 }
 0x6bb   : > { %3496 = vmatpush3.bf16.msra.mxu1 %v1609_v47  ;;  %3497 = vmatprep.mubr.msk.bf16.mxu1 %vm3854_vm2, %v3853_v2 }
 0x6bc   : > { %3507 = vmatprep.subr.bf16.mxu1 %v3853_v2 }
 0x6d1   : > { %v1488_v49 = vpop.xlane.xlu1 %1487 }
 0x6d2   : > { %3735 = vrcp.f32 %v1488_v49 }
 0x6d5   : > { %v1773_v0 = vpop.permute.xlu1 %1772 }
 0x6d6   : > { %v1778_v7 = vsel %vm820_vm3, %v1773_v0, 0 }
 0x6dc   : > { %v1491_v50 = vpop.xlane.xlu0 %1490 }
 0x6dd   : > { %3737 = vrcp.f32 %v1491_v50 }
 0x6df   : > { %v3736_v51 = vpop.eup %3735 }
 0x6e0   : > { %v1500_v52 = vmul.f32 %v3736_v51, %v3728_v31  ;;  %v1723_v55 = vpop.permute.xlu0 %1722 }
 0x6e1   : > { %v1728_v60 = vsel %vm820_vm3, %v1723_v55, 0 }
 0x6e2   : > { %v1504_v53 = vpack.c.bf16 %v1500_v52, %v1500_v52 }
 0x6e4   : > { %3492 = vmatmul.mubr.msk.bf16.vlgmr.msra.gmra.mxu0 %vm820_vm3, %v1504_v53  ;;  %v1721_v59 = vpop.permute.xlu0 %1720 }
 0x6e5   : > { %3502 = vmatpush3.bf16.msra.mxu0 %v1657_v54  ;;  %3503 = vmatprep.mubr.msk.bf16.mxu0 %vm3854_vm2, %v3853_v2 }
 0x6e6   : > { %3513 = vmatprep.subr.bf16.mxu0 %v3853_v2 }
 0x6e8   : > { %v1823_v61 = vpop.permute.xlu0 %1822 }
 0x6e9   : > { %v1828_v62 = vsel %vm820_vm3, %v1823_v61, 0 }
 0x6ea   : > { %v3738_v56 = vpop.eup %3737 }
 0x6eb   : > { %v1501_v57 = vmul.f32 %v3738_v56, %v3730_v33 }
 0x6ec   : > { %v1821_v63 = vpop.permute.xlu0 %1820 }
 0x6ed   : > { %v1505_v58 = vpack.c.bf16 %v1501_v57, %v1501_v57 }
 0x6ef   : > { %3498 = vmatmul.mubr.msk.bf16.vlgmr.msra.gmra.mxu1 %vm820_vm3, %v1505_v58 }
 0x6f0   : > { %3508 = vmatpush3.bf16.xpose.msra.mxu1 %v1728_v60  ;;  %3509 = vmatprep.mubr.msk.bf16.mxu1 %vm3854_vm2, %v3853_v2 }
 0x6f1   : > { %3519 = vmatprep.subr.bf16.mxu1 %v3853_v2 }
 0x6f7   : > { %3510 = vmatmul.mubr.msk.bf16.vlgmr.msra.gmra.mxu1 %vm820_vm3, %v1721_v59 }
 0x6f8   : > { %3520 = vmatpush3.bf16.xpose.msra.mxu1 %v1828_v62  ;;  %3521 = vmatprep.mubr.msk.bf16.mxu1 %vm3854_vm2, %v3853_v2 }
 0x6f9   : > { %3531 = vmatprep.subr.bf16.mxu1 %v3853_v2 }
 0x6ff   : > { %3522 = vmatmul.mubr.msk.bf16.vlgmr.msra.gmra.mxu1 %vm820_vm3, %v1821_v63 }
 0x700   : > { %3533 = vmatprep.mubr.msk.bf16.mxu1 %vm3854_vm2, %v3853_v2 }
 0x706   : > { %v1494_v1 = vpop.xlane.xlu1 %1493 }
 0x707   : > { %3739 = vrcp.f32 %v1494_v1 }
 0x70a   : > { %v1771_v6 = vpop.permute.xlu1 %1770 }
 0x70e   : > { %v1873_v9 = vpop.permute.xlu1 %1872 }
 0x70f   : > { %v1878_v10 = vsel %vm820_vm3, %v1873_v9, 0 }
 0x712   : > { %v1871_v11 = vpop.permute.xlu1 %1870 }
 0x714   : > { %v3740_v3 = vpop.eup %3739 }
 0x715   : > { %v1502_v4 = vmul.f32 %v3740_v3, %v3732_v38 }
 0x717   : > { %v1506_v5 = vpack.c.bf16 %v1502_v4, %v1502_v4 }
 0x719   : > { %3504 = vmatmul.mubr.msk.bf16.vlgmr.msra.gmra.mxu0 %vm820_vm3, %v1506_v5 }
 0x71a   : > { %3514 = vmatpush3.bf16.xpose.msra.mxu0 %v1778_v7  ;;  %3515 = vmatprep.mubr.msk.bf16.mxu0 %vm3854_vm2, %v3853_v2 }
 0x71b   : > { %3525 = vmatprep.subr.bf16.mxu0 %v3853_v2 }
 0x721   : > { %3516 = vmatmul.mubr.msk.bf16.vlgmr.msra.gmra.mxu0 %vm820_vm3, %v1771_v6 }
 0x722   : > { %3526 = vmatpush3.bf16.xpose.msra.mxu0 %v1878_v10  ;;  %3527 = vmatprep.mubr.msk.bf16.mxu0 %vm3854_vm2, %v3853_v2 }
 0x723   : > { %3537 = vmatprep.subr.bf16.mxu0 %v3853_v2 }
 0x729   : > { %3528 = vmatmul.mubr.msk.bf16.vlgmr.msra.gmra.mxu0 %vm820_vm3, %v1871_v11 }
 0x72a   : > { %3539 = vmatprep.mubr.msk.bf16.mxu0 %vm3854_vm2, %v3853_v2 }
 0x77a   : > { %v4225_v14 = vpop.f32.mrf.mxu1 }
 0x77c   : > { %v3487_v16 = vpop.f32.mrf.mxu1 }
 0x77e   : > { %v1552_v17 = vpop.f32.mrf.mxu1 }
 0x780   : > { %v3488_v18 = vpop.f32.mrf.mxu1 }
 0x7a4   : > { %v4227_v19 = vpop.f32.mrf.mxu0 }
 0x7a6   : > { %v3493_v20 = vpop.f32.mrf.mxu0 }
 0x7a8   : > { %v1600_v21 = vpop.f32.mrf.mxu0 }
 0x7aa   : > { %v3494_v22 = vpop.f32.mrf.mxu0 }
 0x7af   : > { %v4229_v23 = vpop.f32.mrf.mxu1 }
 0x7b1   : > { %v3499_v24 = vpop.f32.mrf.mxu1 }
 0x7b3   : > { %v1648_v25 = vpop.f32.mrf.mxu1 }
 0x7b5   : > { %v3500_v26 = vpop.f32.mrf.mxu1 }
 0x7b7   : > { %v1764_v27 = vpop.f32.mrf.mxu1 }
 0x7b8   : > { %v1920_v28 = vsel %vm820_vm3, %v1764_v27, -inf }
 0x7b9   : > { %1921 = vmax.xlane.f32.xlu0 %v1920_v28  ;;  %v3511_v29 = vpop.f32.mrf.mxu1 }
 0x7bb   : > { %v1767_v30 = vpop.f32.mrf.mxu1 }
 0x7bd   : > { %v3512_v31 = vpop.f32.mrf.mxu1 }
 0x7bf   : > { %v1864_v32 = vpop.f32.mrf.mxu1 }
 0x7c0   : > { %v1926_v33 = vsel %vm820_vm3, %v1864_v32, -inf }
 0x7c1   : > { %1927 = vmax.xlane.f32.xlu0 %v1926_v33  ;;  %v3523_v34 = vpop.f32.mrf.mxu1 }
 0x7c3   : > { %v1867_v35 = vpop.f32.mrf.mxu1 }
 0x7c5   : > { %v3524_v36 = vpop.f32.mrf.mxu1 }
 0x7d9   : > { %v4233_v37 = vpop.f32.mrf.mxu0 }
 0x7db   : > { %v3505_v38 = vpop.f32.mrf.mxu0 }
 0x7dd   : > { %v1696_v39 = vpop.f32.mrf.mxu0 }
 0x7df   : > { %v3506_v40 = vpop.f32.mrf.mxu0 }
 0x7e1   : > { %v1814_v41 = vpop.f32.mrf.mxu0 }
 0x7e2   : > { %v1923_v42 = vsel %vm820_vm3, %v1814_v41, -inf }
 0x7e3   : > { %1924 = vmax.xlane.f32.xlu1 %v1923_v42  ;;  %v3517_v43 = vpop.f32.mrf.mxu0 }
 0x7e5   : > { %v1817_v44 = vpop.f32.mrf.mxu0 }
 0x7e7   : > { %v3518_v45 = vpop.f32.mrf.mxu0 }
 0x7e9   : > { %v1914_v46 = vpop.f32.mrf.mxu0 }
 0x7ea   : > { %v1929_v47 = vsel %vm820_vm3, %v1914_v46, -inf }
 0x7eb   : > { %1930 = vmax.xlane.f32.xlu0 %v1929_v47  ;;  %v3529_v48 = vpop.f32.mrf.mxu0 }
 0x7ed   : > { %v1917_v49 = vpop.f32.mrf.mxu0 }
 0x7ef   : > { %v3530_v50 = vpop.f32.mrf.mxu0 }
 0x7f4   : > { %2016 = vrot.lane.b32.xlu1 %v4064_v12, %s3862_s19 }
 0x7f8   : > { %2064 = vrot.lane.b32.xlu1 %v4067_v13, %s3862_s19 }
 0x7fc   : > { %2112 = vrot.lane.b32.xlu1 %v4070_v15, %s3862_s19 }
 0x842   : > { %v1922_v51 = vpop.xlane.xlu0 %1921 }
 0x843   : > { %v1932_v52 = vsub.f32 %v1764_v27, %v1922_v51 }
 0x845   : > { %v1936_v53 = vmul.f32 1.442695, %v1932_v52 }
 0x847   : > { %3741 = vpow2.f32 %v1936_v53 }
 0x84a   : > { %v1928_v58 = vpop.xlane.xlu0 %1927 }
 0x84b   : > { %v1934_v62 = vsub.f32 %v1864_v32, %v1928_v58 }
 0x84d   : > { %v1940_v63 = vmul.f32 1.442695, %v1934_v62 }
 0x854   : > { %v3742_v54 = vpop.eup %3741 }
 0x855   : > { %v1944_v55 = vsel %vm820_vm3, %v3742_v54, 0.0 }
 0x856   : > { %1945 = vadd.xlane.f32.xlu0 %v1944_v55 }
 0x86c   : > { %v1925_v56 = vpop.xlane.xlu1 %1924  ;;  %1968 = vrot.lane.b32.xlu0 %v4061_v8, %s3862_s19 }
 0x86d   : > { %v1933_v57 = vsub.f32 %v1814_v41, %v1925_v56 }
 0x86f   : > { %v1938_v59 = vmul.f32 1.442695, %v1933_v57 }
 0x870   : > { %v2017_v60 = vpop.permute.xlu1 %2016 }
 0x871   : > { %3743 = vpow2.f32 %v1938_v59  ;;  %v2022_v61 = vsel %vm1067_vm4, %v2017_v60, 0 }
 0x872   : > { %3538 = vmatpush3.bf16.msra.mxu0 %v2022_v61  ;;  %3745 = vpow2.f32 %v1940_v63 }
 0x873   : > { %3549 = vmatprep.subr.bf16.mxu0 %v3853_v2 }
 0x874   : > { %v1931_v5 = vpop.xlane.xlu0 %1930  ;;  %v2065_v21 = vpop.permute.xlu1 %2064 }
 0x875   : > { %v1935_v6 = vsub.f32 %v1914_v46, %v1931_v5  ;;  %v2070_v24 = vsel %vm1067_vm4, %v2065_v21, 0 }
 0x877   : > { %v1942_v7 = vmul.f32 1.442695, %v1935_v6 }
 0x878   : > { %v2113_v25 = vpop.permute.xlu1 %2112 }
 0x879   : > { %3747 = vpow2.f32 %v1942_v7  ;;  %v2118_v31 = vsel %vm1067_vm4, %v2113_v25, 0 }
 0x87e   : > { %v3744_v0 = vpop.eup %3743 }
 0x87f   : > { %v1947_v1 = vsel %vm820_vm3, %v3744_v0, 0.0  ;;  %v3746_v3 = vpop.eup %3745 }
 0x880   : > { %1948 = vadd.xlane.f32.xlu1 %v1947_v1  ;;  %v1950_v4 = vsel %vm820_vm3, %v3746_v3, 0.0 }
 0x886   : > { %v3748_v9 = vpop.eup %3747 }
 0x887   : > { %v1953_v10 = vsel %vm820_vm3, %v3748_v9, 0.0 }
 0x88b   : > { %1951 = vadd.xlane.f32.xlu0 %v1950_v4 }
 0x891   : > { %2233 = vrot.lane.b32.xlu1 %v4064_v12, %s3863_s18 }
 0x8a1   : > { %2183 = vrot.lane.b32.xlu0 %v4061_v8, %s3863_s18 }
 0x8a5   : > { %2181 = vrot.lane.b32.xlu0 %v4061_v8, %s3864_s22 }
 0x8a9   : > { %2283 = vrot.lane.b32.xlu0 %v4067_v13, %s3863_s18 }
 0x8ad   : > { %2281 = vrot.lane.b32.xlu0 %v4067_v13, %s3864_s22 }
 0x8b5   : > { %1954 = vadd.xlane.f32.xlu1 %v1953_v10 }
 0x8c6   : > { %2231 = vrot.lane.b32.xlu1 %v4064_v12, %s3864_s22 }
 0x8ca   : > { %2333 = vrot.lane.b32.xlu1 %v4070_v15, %s3863_s18  ;;  %s4472_s18 = sld [smem:[#allocation7_spill]] }
 0x8ce   : > { %2331 = vrot.lane.b32.xlu1 %v4070_v15, %s3864_s22  ;;  %s3869_s22 = smov [#allocation3]  }
 0x8d0   : > { %s4473_s30 = sadd.s32 4294967295, %s4472_s18  }
 0x8d1   : > { %p4413_p6 = scmp.eq.s32.totalorder %s4473_s30, 1 }
 0x8df   : > { %v1946_v11 = vpop.xlane.xlu0 %1945 }
 0x8e0   : > { %3749 = vrcp.f32 %v1946_v11 }
 0x8e3   : > { %v1969_v16 = vpop.permute.xlu0 %1968 }
 0x8e4   : > { %v1974_v17 = vsel %vm1067_vm4, %v1969_v16, 0 }
 0x8e5   : > { %3532 = vmatpush3.bf16.msra.mxu1 %v1974_v17 }
 0x8e6   : > { %3543 = vmatprep.subr.bf16.mxu1 %v3853_v2 }
 0x8ed   : > { %v3750_v18 = vpop.eup %3749 }
 0x8ee   : > { %v1960_v20 = vmul.f32 %v3750_v18, %v3742_v54 }
 0x8f0   : > { %v1964_v22 = vpack.c.bf16 %v1960_v20, %v1960_v20 }
 0x8f2   : > { %3534 = vmatmul.mubr.msk.bf16.vlgmr.msra.gmra.mxu1 %vm820_vm3, %v1964_v22 }
 0x8f3   : > { %3544 = vmatpush3.bf16.msra.mxu1 %v2070_v24  ;;  %3545 = vmatprep.mubr.msk.bf16.mxu1 %vm3854_vm2, %v3853_v2 }
 0x8f4   : > { %3555 = vmatprep.subr.bf16.mxu1 %v3853_v2 }
 0x909   : > { %v1949_v26 = vpop.xlane.xlu1 %1948 }
 0x90a   : > { %3751 = vrcp.f32 %v1949_v26 }
 0x90d   : > { %v2234_v42 = vpop.permute.xlu1 %2233 }
 0x90e   : > { %v2239_v48 = vsel %vm820_vm3, %v2234_v42, 0 }
 0x914   : > { %v1952_v27 = vpop.xlane.xlu0 %1951 }
 0x915   : > { %3753 = vrcp.f32 %v1952_v27 }
 0x917   : > { %v3752_v28 = vpop.eup %3751 }
 0x918   : > { %v1961_v29 = vmul.f32 %v3752_v28, %v3744_v0  ;;  %v2184_v32 = vpop.permute.xlu0 %2183 }
 0x919   : > { %v2189_v38 = vsel %vm820_vm3, %v2184_v32, 0 }
 0x91a   : > { %v1965_v30 = vpack.c.bf16 %v1961_v29, %v1961_v29 }
 0x91c   : > { %3540 = vmatmul.mubr.msk.bf16.vlgmr.msra.gmra.mxu0 %vm820_vm3, %v1965_v30  ;;  %v2182_v36 = vpop.permute.xlu0 %2181 }
 0x91d   : > { %3550 = vmatpush3.bf16.msra.mxu0 %v2118_v31  ;;  %3551 = vmatprep.mubr.msk.bf16.mxu0 %vm3854_vm2, %v3853_v2 }
 0x91e   : > { %3561 = vmatprep.subr.bf16.mxu0 %v3853_v2 }
 0x920   : > { %v2284_v39 = vpop.permute.xlu0 %2283 }
 0x921   : > { %v2289_v40 = vsel %vm820_vm3, %v2284_v39, 0 }
 0x922   : > { %v3754_v33 = vpop.eup %3753 }
 0x923   : > { %v1962_v34 = vmul.f32 %v3754_v33, %v3746_v3 }
 0x924   : > { %v2282_v41 = vpop.permute.xlu0 %2281 }
 0x925   : > { %v1966_v35 = vpack.c.bf16 %v1962_v34, %v1962_v34 }
 0x927   : > { %3546 = vmatmul.mubr.msk.bf16.vlgmr.msra.gmra.mxu1 %vm820_vm3, %v1966_v35 }
 0x928   : > { %3556 = vmatpush3.bf16.xpose.msra.mxu1 %v2189_v38  ;;  %3557 = vmatprep.mubr.msk.bf16.mxu1 %vm3854_vm2, %v3853_v2 }
 0x929   : > { %3567 = vmatprep.subr.bf16.mxu1 %v3853_v2 }
 0x92f   : > { %3558 = vmatmul.mubr.msk.bf16.vlgmr.msra.gmra.mxu1 %vm820_vm3, %v2182_v36 }
 0x930   : > { %3568 = vmatpush3.bf16.xpose.msra.mxu1 %v2289_v40  ;;  %3569 = vmatprep.mubr.msk.bf16.mxu1 %vm3854_vm2, %v3853_v2 }
 0x931   : > { %3579 = vmatprep.subr.bf16.mxu1 %v3853_v2 }
 0x937   : > { %3570 = vmatmul.mubr.msk.bf16.vlgmr.msra.gmra.mxu1 %vm820_vm3, %v2282_v41 }
 0x938   : > { %3581 = vmatprep.mubr.msk.bf16.mxu1 %vm3854_vm2, %v3853_v2 }
 0x93e   : > { %v1955_v43 = vpop.xlane.xlu1 %1954 }
 0x93f   : > { %3755 = vrcp.f32 %v1955_v43 }
 0x942   : > { %v2232_v47 = vpop.permute.xlu1 %2231 }
 0x946   : > { %v2334_v49 = vpop.permute.xlu1 %2333 }
 0x947   : > { %v2339_v50 = vsel %vm820_vm3, %v2334_v49, 0 }
 0x94a   : > { %v2332_v51 = vpop.permute.xlu1 %2331 }
 0x94c   : > { %v3756_v44 = vpop.eup %3755 }
 0x94d   : > { %v1963_v45 = vmul.f32 %v3756_v44, %v3748_v9 }
 0x94f   : > { %v1967_v46 = vpack.c.bf16 %v1963_v45, %v1963_v45 }
 0x951   : > { %3552 = vmatmul.mubr.msk.bf16.vlgmr.msra.gmra.mxu0 %vm820_vm3, %v1967_v46 }
 0x952   : > { %3562 = vmatpush3.bf16.xpose.msra.mxu0 %v2239_v48  ;;  %3563 = vmatprep.mubr.msk.bf16.mxu0 %vm3854_vm2, %v3853_v2 }
 0x953   : > { %3573 = vmatprep.subr.bf16.mxu0 %v3853_v2 }
 0x959   : > { %3564 = vmatmul.mubr.msk.bf16.vlgmr.msra.gmra.mxu0 %vm820_vm3, %v2232_v47 }
 0x95a   : > { %3574 = vmatpush3.bf16.xpose.msra.mxu0 %v2339_v50  ;;  %3575 = vmatprep.mubr.msk.bf16.mxu0 %vm3854_vm2, %v3853_v2 }
 0x95b   : > { %3585 = vmatprep.subr.bf16.mxu0 %v3853_v2 }
 0x961   : > { %3576 = vmatmul.mubr.msk.bf16.vlgmr.msra.gmra.mxu0 %vm820_vm3, %v2332_v51 }
 0x962   : > { %3587 = vmatprep.mubr.msk.bf16.mxu0 %vm3854_vm2, %v3853_v2 }
 0x9b2   : > { %v4293_v52 = vpop.f32.mrf.mxu1 }
 0x9b4   : > { %v3535_v53 = vpop.f32.mrf.mxu1 }
 0x9b6   : > { %v2013_v54 = vpop.f32.mrf.mxu1 }
 0x9b8   : > { %v3536_v55 = vpop.f32.mrf.mxu1 }
 0x9dc   : > { %v4295_v56 = vpop.f32.mrf.mxu0 }
 0x9de   : > { %v3541_v57 = vpop.f32.mrf.mxu0 }
 0x9e0   : > { %v2061_v58 = vpop.f32.mrf.mxu0 }
 0x9e2   : > { %v3542_v59 = vpop.f32.mrf.mxu0 }
 0x9e7   : > { %v2106_v60 = vpop.f32.mrf.mxu1 }
 0x9e9   : > { %v3547_v61 = vpop.f32.mrf.mxu1 }
 0x9eb   : > { %v2109_v62 = vpop.f32.mrf.mxu1 }
 0x9ed   : > { %v3548_v63 = vpop.f32.mrf.mxu1 }
 0x9ef   : > { %v2225_v0 = vpop.f32.mrf.mxu1 }
 0x9f0   : > { %v2381_v1 = vsel %vm820_vm3, %v2225_v0, -inf }
 0x9f1   : > { %2382 = vmax.xlane.f32.xlu0 %v2381_v1  ;;  %v3559_v3 = vpop.f32.mrf.mxu1 }
 0x9f3   : > { %v2228_v4 = vpop.f32.mrf.mxu1 }
 0x9f5   : > { %v3560_v5 = vpop.f32.mrf.mxu1 }
 0x9f7   : > { %v2325_v6 = vpop.f32.mrf.mxu1 }
 0x9f8   : > { %v2387_v7 = vsel %vm820_vm3, %v2325_v6, -inf }
 0x9f9   : > { %2388 = vmax.xlane.f32.xlu0 %v2387_v7  ;;  %v3571_v9 = vpop.f32.mrf.mxu1 }
 0x9fb   : > { %v2328_v10 = vpop.f32.mrf.mxu1 }
 0x9fd   : > { %v3572_v11 = vpop.f32.mrf.mxu1 }
 0xa11   : > { %v2154_v16 = vpop.f32.mrf.mxu0 }
 0xa13   : > { %v3553_v17 = vpop.f32.mrf.mxu0 }
 0xa15   : > { %v2157_v18 = vpop.f32.mrf.mxu0 }
 0xa17   : > { %v3554_v20 = vpop.f32.mrf.mxu0 }
 0xa19   : > { %v2275_v21 = vpop.f32.mrf.mxu0 }
 0xa1a   : > { %v2384_v22 = vsel %vm820_vm3, %v2275_v21, -inf }
 0xa1b   : > { %2385 = vmax.xlane.f32.xlu1 %v2384_v22  ;;  %v3565_v24 = vpop.f32.mrf.mxu0 }
 0xa1d   : > { %v2278_v25 = vpop.f32.mrf.mxu0 }
 0xa1f   : > { %v3566_v26 = vpop.f32.mrf.mxu0 }
 0xa21   : > { %v2375_v27 = vpop.f32.mrf.mxu0 }
 0xa22   : > { %v2390_v28 = vsel %vm820_vm3, %v2375_v27, -inf }
 0xa23   : > { %2391 = vmax.xlane.f32.xlu0 %v2390_v28  ;;  %v3577_v29 = vpop.f32.mrf.mxu0 }
 0xa25   : > { %v2378_v30 = vpop.f32.mrf.mxu0 }
 0xa27   : > { %v3578_v31 = vpop.f32.mrf.mxu0 }
 0xa7a   : > { %v2383_v32 = vpop.xlane.xlu0 %2382 }
 0xa7b   : > { %v2393_v33 = vsub.f32 %v2225_v0, %v2383_v32  ;;  %v3689_v32 = vld [vmem:[%s4470_s28 + $0x8] sm:$0xff]  }
 0xa7d   : > { %v2397_v34 = vmul.f32 1.442695, %v2393_v33  ;;  %v3690_v33 = vld [vmem:[%s4470_s28] sm:$0xff]  }
 0xa7f   : > { %3757 = vpow2.f32 %v2397_v34 }
 0xa82   : > { %v2389_v35 = vpop.xlane.xlu0 %2388 }
 0xa83   : > { %v2395_v36 = vsub.f32 %v2325_v6, %v2389_v35 }
 0xa85   : > { %v2401_v38 = vmul.f32 1.442695, %v2395_v36 }
 0xa87   : > { %3759 = vpow2.f32 %v2401_v38 }
 0xa8c   : > { %v3758_v39 = vpop.eup %3757 }
 0xa8d   : > { %v2405_v40 = vsel %vm820_vm3, %v3758_v39, 0.0 }
 0xa8e   : > { %2406 = vadd.xlane.f32.xlu0 %v2405_v40 }
 0xa94   : > { %v3760_v41 = vpop.eup %3759 }
 0xa95   : > { %v2411_v42 = vsel %vm820_vm3, %v3760_v41, 0.0 }
 0xa96   : > { %2412 = vadd.xlane.f32.xlu0 %v2411_v42 }
 0xaa4   : > { %v2386_v43 = vpop.xlane.xlu1 %2385 }
 0xaa5   : > { %v2394_v44 = vsub.f32 %v2275_v21, %v2386_v43 }
 0xaa7   : > { %v2399_v45 = vmul.f32 1.442695, %v2394_v44 }
 0xaa9   : > { %3761 = vpow2.f32 %v2399_v45 }
 0xaac   : > { %2429 = vrot.lane.b32.xlu0 %v4061_v8, %s3865_s24  ;;  %v2392_v8 = vpop.xlane.xlu0 %2391 }
 0xaad   : > { %v2396_v48 = vsub.f32 %v2375_v27, %v2392_v8 }
 0xaaf   : > { %v2403_v49 = vmul.f32 1.442695, %v2396_v48 }
 0xab0   : > { %1703 = vrot.lane.b32.xlu0 %v4225_v14, %s3866_s20 }
 0xab1   : > { %3763 = vpow2.f32 %v2403_v49  ;;  %v3284_v49 = vld [vmem:[%s4471_s25] ss:$0 sm:$0xff] }
 0xab4   : > { %1707 = vrot.lane.b32.xlu0 %v4229_v23, %s3866_s20 }
 0xab6   : > { %v3762_v46 = vpop.eup %3761 }
 0xab7   : > { %v2408_v47 = vsel %vm820_vm3, %v3762_v46, 0.0 }
 0xab8   : > { %2409 = vadd.xlane.f32.xlu1 %v2408_v47  ;;  %2164 = vrot.lane.b32.xlu0 %v4293_v52, %s3867_s14 }
 0xabc   : > { %2168 = vrot.lane.b32.xlu0 %v2106_v60, %s3867_s14 }
 0xabe   : > { %v3764_v14 = vpop.eup %3763 }
 0xabf   : > { %v2414_v50 = vsel %vm820_vm3, %v3764_v14, 0.0 }
 0xac9   : > { %2477 = vrot.lane.b32.xlu1 %v4064_v12, %s3865_s24 }
 0xacd   : > { %2525 = vrot.lane.b32.xlu1 %v4067_v13, %s3865_s24 }
 0xaf1   : > { %2415 = vadd.xlane.f32.xlu1 %v2414_v50 }
 0xb02   : > { %2573 = vrot.lane.b32.xlu1 %v4070_v15, %s3865_s24  ;;  %s3055_s24 = sshll.u32 %s3869_s22, 4  ;;  %s3056_s24 = int_to_ptr.vmem [resolvable:$true] %s3055_s24 }
 0xb03   : > { %p3808_p10 = scmp.lt.s32.totalorder %s3056_s24, %s3056_s24 }
 0xb06   : > { %1705 = vrot.lane.b32.xlu1 %v4227_v19, %s3866_s20 }
 0xb0a   : > { %1709 = vrot.lane.b32.xlu1 %v4233_v37, %s3866_s20 }
 0xb0e   : > { %2166 = vrot.lane.b32.xlu1 %v4295_v56, %s3867_s14 }
 0xb12   : > { %2170 = vrot.lane.b32.xlu1 %v2154_v16, %s3867_s14  ;;  %s3801_s14 = scalar_lea.vmem %s3056_s24, 512 }
 0xb13   : > { %p3802_p7 = scmp.ne.s32.totalorder %s3056_s24, %s3801_s14  ;;  %p3809_p11 = scmp.lt.s32.totalorder %s3801_s14, %s3801_s14 }
 0xb15   : > { %p3803_p8 = pnand %p3802_p7, %p4413_p6  ;;  %p3810_p12 = por %p3809_p11, %p3808_p10 }
 0xb17   : > { %v2407_v12 = vpop.xlane.xlu0 %2406  ;;  %p3804_p9 = pneg %p3803_p8 }
 0xb18   : > { %3765 = vrcp.f32 %v2407_v12 }
 0xb19   : > { %p3811_p13 = pnand %p3810_p12, %p3804_p9 }
 0xb1f   : > { %v2413_v13 = vpop.xlane.xlu0 %2412 }
 0xb20   : > { %3767 = vrcp.f32 %v2413_v13 }
 0xb23   : > { %v2430_v23 = vpop.permute.xlu0 %2429 }
 0xb24   : > { %v2435_v51 = vsel %vm1067_vm4, %v2430_v23, 0  ;;  %v3797_v23 = vld [vmem:[#allocation3] sm:$0xff] }
 0xb25   : > { %v3766_v52 = vpop.eup %3765  ;;  %3580 = vmatpush3.bf16.msra.mxu1 %v2435_v51 }
 0xb26   : > { %v2421_v53 = vmul.f32 %v3766_v52, %v3758_v39  ;;  %3591 = vmatprep.subr.bf16.mxu1 %v3853_v2 }
 0xb27   : > { %v1704_v15 = vpop.permute.xlu0 %1703 }
 0xb28   : > { %1716 = vst.msk [vmem:[#allocation2] sm:$0xff] %vm1715_vm5, %v1704_v15  ;;  %v2425_v19 = vpack.c.bf16 %v2421_v53, %v2421_v53  ;;  %v3798_v53 = vld [vmem:[#allocation3 + $0x10] sm:$0xff] }
 0xb2a   : > { %3582 = vmatmul.mubr.msk.bf16.vlgmr.msra.gmra.mxu1 %vm820_vm3, %v2425_v19 }
 0xb2b   : > { %v1708_v37 = vpop.permute.xlu0 %1707  ;;  %3593 = vmatprep.mubr.msk.bf16.mxu1 %vm3854_vm2, %v3853_v2 }
 0xb2c   : > { %1718 = vst.msk [vmem:[#allocation2 + $0x10] sm:$0xff] %vm1715_vm5, %v1708_v37 }
 0xb2d   : > { %v3768_v57 = vpop.eup %3767 }
 0xb2e   : > { %v2423_v60 = vmul.f32 %v3768_v57, %v3760_v41  ;;  %v3800_v57 = vld [vmem:[#allocation3 + $0x18] sm:$0xff] }
 0xb2f   : > { %v2165_v54 = vpop.permute.xlu0 %2164 }
 0xb30   : > { %2177 = vst.msk [vmem:[#allocation2] sm:$0xff] %vm2176_vm6, %v2165_v54  ;;  %v2427_v63 = vpack.c.bf16 %v2423_v60, %v2423_v60 }
 0xb33   : > { %v2169_v55 = vpop.permute.xlu0 %2168 }
 0xb34   : > { %2179 = vst.msk [vmem:[#allocation2 + $0x10] sm:$0xff] %vm2176_vm6, %v2169_v55  ;;  %v3799_v55 = vld [vmem:[#allocation3 + $0x8] sm:$0xff] }
 0xb41   : > { %v2410_v56 = vpop.xlane.xlu1 %2409 }
 0xb42   : > { %3769 = vrcp.f32 %v2410_v56 }
 0xb45   : > { %v2478_v58 = vpop.permute.xlu1 %2477 }
 0xb46   : > { %v2483_v59 = vsel %vm1067_vm4, %v2478_v58, 0 }
 0xb47   : > { %3586 = vmatpush3.bf16.msra.mxu0 %v2483_v59 }
 0xb48   : > { %3597 = vmatprep.subr.bf16.mxu0 %v3853_v2 }
 0xb49   : > { %v2526_v61 = vpop.permute.xlu1 %2525 }
 0xb4a   : > { %v2531_v62 = vsel %vm1067_vm4, %v2526_v61, 0 }
 0xb4b   : > { %3592 = vmatpush3.bf16.msra.mxu1 %v2531_v62 }
 0xb4c   : > { %3603 = vmatprep.subr.bf16.mxu1 %v3689_v32 }
 0xb4e   : > { %3594 = vmatmul.mubr.msk.bf16.vlgmr.msra.gmra.mxu1 %vm820_vm3, %v2427_v63 }
 0xb4f   : > { %v3770_v0 = vpop.eup %3769  ;;  %3604 = vmatpush3.bf16.msra.mxu1 %v3689_v32 }
 0xb50   : > { %v2422_v1 = vmul.f32 %v3770_v0, %v3762_v46  ;;  %3605 = vmatprep.subr.bf16.mxu1 %v3690_v33 }
 0xb52   : > { %v2426_v3 = vpack.c.bf16 %v2422_v1, %v2422_v1 }
 0xb53   : > { %3606 = vmatpush3.bf16.msra.mxu1 %v3690_v33 }
 0xb54   : > { %3588 = vmatmul.mubr.msk.bf16.vlgmr.msra.gmra.mxu0 %vm820_vm3, %v2426_v3 }
 0xb55   : > { %3599 = vmatprep.mubr.msk.bf16.mxu0 %vm3854_vm2, %v3853_v2 }
 0xb7a   : > { %v2416_v4 = vpop.xlane.xlu1 %2415 }
 0xb7b   : > { %3771 = vrcp.f32 %v2416_v4 }
 0xb7e   : > { %v2574_v5 = vpop.permute.xlu1 %2573 }
 0xb7f   : > { %v2579_v6 = vsel %vm1067_vm4, %v2574_v5, 0 }
 0xb80   : > { %3598 = vmatpush3.bf16.msra.mxu0 %v2579_v6 }
 0xb82   : > { %v1706_v7 = vpop.permute.xlu1 %1705 }
 0xb83   : > { %1717 = vst.msk [vmem:[#allocation2 + $0x8] sm:$0xff] %vm1715_vm5, %v1706_v7 }
 0xb86   : > { %v1710_v9 = vpop.permute.xlu1 %1709 }
 0xb87   : > { %1719 = vst.msk [vmem:[#allocation2 + $0x18] sm:$0xff] %vm1715_vm5, %v1710_v9 }
 0xb88   : > { %v3772_v10 = vpop.eup %3771 }
 0xb89   : > { %v2424_v11 = vmul.f32 %v3772_v10, %v3764_v14 }
 0xb8a   : > { %v2167_v16 = vpop.permute.xlu1 %2166 }
 0xb8b   : > { %2178 = vst.msk [vmem:[#allocation2 + $0x8] sm:$0xff] %vm2176_vm6, %v2167_v16  ;;  %v2428_v17 = vpack.c.bf16 %v2424_v11, %v2424_v11 }
 0xb8d   : > { %3600 = vmatmul.mubr.msk.bf16.vlgmr.msra.gmra.mxu0 %vm820_vm3, %v2428_v17 }
 0xb8e   : > { %v2171_v2 = vpop.permute.xlu1 %2170 }
 0xb8f   : > { %2180 = vst.msk [vmem:[#allocation2 + $0x18] sm:$0xff] %vm2176_vm6, %v2171_v2 }
 0xbea   : > { %v2471_v18 = vpop.f32.mrf.mxu1 }
 0xbeb   : > { %2625 = vrot.lane.b32.xlu0 %v2471_v18, %s3868_s29 }
 0xbec   : > { %v3583_v20 = vpop.f32.mrf.mxu1 }
 0xbee   : > { %v2474_v21 = vpop.f32.mrf.mxu1 }
 0xbf0   : > { %v3584_v22 = vpop.f32.mrf.mxu1 }
 0xc0e   : > { %v2567_v24 = vpop.f32.mrf.mxu1 }
 0xc0f   : > { %2629 = vrot.lane.b32.xlu0 %v2567_v24, %s3868_s29 }
 0xc10   : > { %v3595_v25 = vpop.f32.mrf.mxu1 }
 0xc11   : > { %v3691_v25 = vld [vmem:[%s4000_s3 + $0x8] sm:$0xff]  }
 0xc12   : > { %v2570_v26 = vpop.f32.mrf.mxu1  ;;  %3611 = vmatprep.subr.bf16.mxu0 %v3691_v25 }
 0xc13   : > { %v3692_v26 = vld [vmem:[%s4000_s3] sm:$0xff]   ;;  %3612 = vmatpush3.bf16.msra.mxu0 %v3691_v25 }
 0xc14   : > { %v2519_v27 = vpop.f32.mrf.mxu0  ;;  %v3596_v28 = vpop.f32.mrf.mxu1  ;;  %3613 = vmatprep.subr.bf16.mxu0 %v3692_v26 }
 0xc15   : > { %2627 = vrot.lane.b32.xlu1 %v2519_v27, %s3868_s29 }
 0xc16   : > { %v3589_v29 = vpop.f32.mrf.mxu0 }
 0xc17   : > { %3614 = vmatpush3.bf16.msra.mxu0 %v3692_v26 }
 0xc18   : > { %v2522_v30 = vpop.f32.mrf.mxu0 }
 0xc1a   : > { %v3590_v31 = vpop.f32.mrf.mxu0 }
 0xc4d   : > { %v2615_v34 = vpop.f32.mrf.mxu0 }
 0xc4e   : > { %2631 = vrot.lane.b32.xlu1 %v2615_v34, %s3868_s29 }
 0xc4f   : > { %v3601_v35 = vpop.f32.mrf.mxu0 }
 0xc51   : > { %v2618_v36 = vpop.f32.mrf.mxu0 }
 0xc53   : > { %v3602_v38 = vpop.f32.mrf.mxu0 }
 0xc5d   : > { %v2626_v39 = vpop.permute.xlu0 %2625 }
 0xc5e   : > { %2638 = vst.msk [vmem:[#allocation2] sm:$0xff] %vm2637_vm7, %v2626_v39 }
 0xc65   : > { %v2642_v42 = vld [vmem:[#allocation2] sm:$0xff] }
 0xc81   : > { %v2630_v40 = vpop.permute.xlu0 %2629 }
 0xc82   : > { %2640 = vst.msk [vmem:[#allocation2 + $0x10] sm:$0xff] %vm2637_vm7, %v2630_v40 }
 0xc87   : > { %v2628_v41 = vpop.permute.xlu1 %2627 }
 0xc88   : > { %2639 = vst.msk [vmem:[#allocation2 + $0x8] sm:$0xff] %vm2637_vm7, %v2628_v41 }
 0xc89   : > { %v2644_v46 = vld [vmem:[#allocation2 + $0x10] sm:$0xff] }
 0xc8f   : > { %v2643_v43 = vld [vmem:[#allocation2 + $0x8] sm:$0xff] }
 0xc90   : > { %v2646_v44 = vpack.c.bf16 %v2643_v43, %v2642_v42  ;;  %v3289_v42 = vld [vmem:[%s618_s27] ss:$0 sm:$0xff] }
 0xc92   : > { %3607 = vmatprep.mubr.msk.bf16.mxu1 %vm659_vm1, %v2646_v44 }
 0xcc0   : > { %v2632_v45 = vpop.permute.xlu1 %2631 }
 0xcc1   : > { %2641 = vst.msk [vmem:[#allocation2 + $0x18] sm:$0xff] %vm2637_vm7, %v2632_v45 }
 0xcc8   : > { %v2645_v47 = vld [vmem:[#allocation2 + $0x18] sm:$0xff] }
 0xcc9   : > { %v2647_v8 = vpack.c.bf16 %v2645_v47, %v2644_v46 }
 0xccb   : > { %3608 = vmatmul.mubr.msk.bf16.vlgmr.msra.gmra.mxu1 %vm659_vm1, %v2647_v8  ;;  %v3290_v8 = vld [vmem:[%s621_s23] ss:$0 sm:$0xff] }
 0xd8b   : > { %v3609_v48 = vpop.f32.mrf.mxu1 }
 0xd8c   : > { %v2720_v50 = vadd.f32 %v3609_v48, %v3284_v49 }
 0xd8d   : > { %v2711_v14 = vpop.f32.mrf.mxu1 }
 0xd8e   : > { %v2712_v12 = vadd.f32 %v3284_v49, %v2711_v14  ;;  %v4352_v15 = vadd.f32 %v3798_v53, %v2720_v50 }
 0xd8f   : > { %v3610_v13 = vpop.f32.mrf.mxu1 }
 0xd90   : > { %v4350_v51 = vadd.f32 %v3797_v23, %v2712_v12  ;;  %v2723_v19 = vadd.f32 %v3610_v13, %v3284_v49  ;;  %v2738_v60 = vsel %vm659_vm1, %v4352_v15, 0.0 }
 0xd91   : > { %v2714_v52 = vpop.f32.mrf.mxu1 }
 0xd92   : > { %v2715_v37 = vadd.f32 %v3284_v49, %v2714_v52  ;;  %v2732_v54 = vsel %vm659_vm1, %v4350_v51, 0.0  ;;  %v4358_v58 = vadd.f32 %v3800_v57, %v2723_v19  ;;  %v3695_v57 = vld [vmem:[%s4010_s17 + $0x28] sm:$0xff]  }
 0xd93   : > { %2733 = vadd.xlane.f32.xlu0 %v2732_v54  ;;  %v3693_v54 = vld [vmem:[%s4010_s17 + $0x38] sm:$0xff]  }
 0xd94   : > { %v4356_v56 = vadd.f32 %v3799_v55, %v2715_v37  ;;  %v2741_v61 = vsel %vm659_vm1, %v4358_v58, 0.0  ;;  %3619 = vmatprep.subr.bf16.mxu1 %v3693_v54  ;;  %v3694_v55 = vld [vmem:[%s4010_s17 + $0x30] sm:$0xff]  }
 0xd95   : > { %3620 = vmatpush3.bf16.msra.mxu1 %v3693_v54 }
 0xd96   : > { %v2735_v59 = vsel %vm659_vm1, %v4356_v56, 0.0  ;;  %3621 = vmatprep.subr.bf16.mxu1 %v3694_v55 }
 0xd97   : > { %2736 = vadd.xlane.f32.xlu1 %v2735_v59  ;;  %2739 = vadd.xlane.f32.xlu0 %v2738_v60  ;;  %v3696_v59 = vld [vmem:[%s4010_s17 + $0x20] sm:$0xff]   ;;  %v3697_v60 = vld [vmem:[%s4010_s17 + $0x18] sm:$0xff]  }
 0xd99   : > { %3622 = vmatpush3.bf16.msra.mxu1 %v3694_v55 }
 0xd9a   : > { %3623 = vmatprep.subr.bf16.mxu1 %v3695_v57 }
 0xd9b   : > { %2742 = vadd.xlane.f32.xlu0 %v2741_v61  ;;  %v3698_v61 = vld [vmem:[%s4010_s17 + $0x10] sm:$0xff]  }
 0xd9d   : > { %3624 = vmatpush3.bf16.msra.mxu1 %v3695_v57 }
 0xd9e   : > { %3625 = vmatprep.subr.bf16.mxu1 %v3696_v59 }
 0xda1   : > { %3626 = vmatpush3.bf16.msra.mxu1 %v3696_v59 }
 0xda2   : > { %3627 = vmatprep.subr.bf16.mxu1 %v3697_v60 }
 0xda5   : > { %3628 = vmatpush3.bf16.msra.mxu1 %v3697_v60 }
 0xda6   : > { %3629 = vmatprep.subr.bf16.mxu1 %v3698_v61 }
 0xda9   : > { %3630 = vmatpush3.bf16.msra.mxu1 %v3698_v61 }
 0xe1c   : > { %v2734_v62 = vpop.xlane.xlu0 %2733 }
 0xe1d   : > { %v2744_v63 = vmul.f32 0.03125, %v2734_v62  ;;  %v3699_v62 = vld [vmem:[%s4010_s17 + $0x8] sm:$0xff]  }
 0xe1e   : > { %3631 = vmatprep.subr.bf16.mxu1 %v3699_v62 }
 0xe1f   : > { %v2748_v0 = vsub.f32 %v4350_v51, %v2744_v63  ;;  %3632 = vmatpush3.bf16.msra.mxu1 %v3699_v62  ;;  %v3700_v63 = vld [vmem:[%s4010_s17] sm:$0xff]  }
 0xe20   : > { %v2737_v1 = vpop.xlane.xlu1 %2736  ;;  %v2740_v3 = vpop.xlane.xlu0 %2739  ;;  %3633 = vmatprep.subr.bf16.mxu1 %v3700_v63 }
 0xe21   : > { %v2745_v4 = vmul.f32 0.03125, %v2737_v1  ;;  %v2746_v5 = vmul.f32 0.03125, %v2740_v3  ;;  %v2752_v6 = vmul.f32 %v2748_v0, %v2748_v0 }
 0xe23   : > { %v2749_v7 = vsub.f32 %v4356_v56, %v2745_v4  ;;  %v2750_v9 = vsub.f32 %v4352_v15, %v2746_v5  ;;  %v2756_v10 = vsel %vm659_vm1, %v2752_v6, 0.0  ;;  %3634 = vmatpush3.bf16.msra.mxu1 %v3700_v63 }
 0xe24   : > { %2757 = vadd.xlane.f32.xlu0 %v2756_v10  ;;  %v2743_v11 = vpop.xlane.xlu0 %2742 }
 0xe25   : > { %v2747_v16 = vmul.f32 0.03125, %v2743_v11  ;;  %v2753_v17 = vmul.f32 %v2749_v7, %v2749_v7  ;;  %v2754_v2 = vmul.f32 %v2750_v9, %v2750_v9 }
 0xe27   : > { %v2751_v18 = vsub.f32 %v4358_v58, %v2747_v16  ;;  %v2759_v20 = vsel %vm659_vm1, %v2753_v17, 0.0  ;;  %v2762_v21 = vsel %vm659_vm1, %v2754_v2, 0.0 }
 0xe28   : > { %2760 = vadd.xlane.f32.xlu1 %v2759_v20  ;;  %2763 = vadd.xlane.f32.xlu0 %v2762_v21 }
 0xe29   : > { %v2755_v22 = vmul.f32 %v2751_v18, %v2751_v18 }
 0xe2b   : > { %v2765_v24 = vsel %vm659_vm1, %v2755_v22, 0.0 }
 0xe2c   : > { %2766 = vadd.xlane.f32.xlu1 %v2765_v24 }
 0xead   : > { %v2758_v27 = vpop.xlane.xlu0 %2757 }
 0xeae   : > { %v2768_v28 = vmul.f32 0.03125, %v2758_v27 }
 0xeb0   : > { %v2772_v29 = vadd.f32 1e-05, %v2768_v28 }
 0xeb1   : > { %v2761_v30 = vpop.xlane.xlu1 %2760  ;;  %v2764_v31 = vpop.xlane.xlu0 %2763 }
 0xeb2   : > { %3773 = vrsqrt.f32 %v2772_v29  ;;  %v2769_v32 = vmul.f32 0.03125, %v2761_v30  ;;  %v2770_v33 = vmul.f32 0.03125, %v2764_v31 }
 0xeb4   : > { %v2773_v34 = vadd.f32 1e-05, %v2769_v32  ;;  %v2774_v35 = vadd.f32 1e-05, %v2770_v33 }
 0xeb5   : > { %v2767_v36 = vpop.xlane.xlu1 %2766 }
 0xeb6   : > { %3775 = vrsqrt.f32 %v2773_v34  ;;  %v2771_v38 = vmul.f32 0.03125, %v2767_v36 }
 0xeb7   : > { %3777 = vrsqrt.f32 %v2774_v35 }
 0xeb8   : > { %v2775_v39 = vadd.f32 1e-05, %v2771_v38 }
 0xeba   : > { %3779 = vrsqrt.f32 %v2775_v39 }
 0xebf   : > { %v3774_v40 = vpop.eup %3773 }
 0xec0   : > { %v2780_v41 = vmul.f32 %v3774_v40, %v2748_v0  ;;  %v3291_v0 = vld [vmem:[%s629_s5] ss:$0 sm:$0xff] }
 0xec2   : > { %v2790_v46 = vmul.f32 %v3289_v42, %v2780_v41 }
 0xec3   : > { %v3776_v43 = vpop.eup %3775 }
 0xec4   : > { %v3778_v44 = vpop.eup %3777  ;;  %v2781_v45 = vmul.f32 %v3776_v43, %v2749_v7  ;;  %v2800_v50 = vadd.f32 %v3290_v8, %v2790_v46  ;;  %v3300_v43 = vld [vmem:[%s637_s21] ss:$0 sm:$0xff] }
 0xec5   : > { %v2782_v47 = vmul.f32 %v3778_v44, %v2750_v9 }
 0xec6   : > { %v2791_v48 = vmul.f32 %v3289_v42, %v2781_v45 }
 0xec7   : > { %v3780_v49 = vpop.eup %3779  ;;  %v2792_v13 = vmul.f32 %v3289_v42, %v2782_v47 }
 0xec8   : > { %v2783_v14 = vmul.f32 %v3780_v49, %v2751_v18  ;;  %v2801_v12 = vadd.f32 %v3290_v8, %v2791_v48 }
 0xec9   : > { %v2802_v53 = vadd.f32 %v3290_v8, %v2792_v13 }
 0xeca   : > { %v2804_v23 = vpack.c.bf16 %v2801_v12, %v2800_v50  ;;  %v2793_v52 = vmul.f32 %v3289_v42, %v2783_v14 }
 0xecc   : > { %3615 = vmatprep.mubr.msk.bf16.mxu0 %vm659_vm1, %v2804_v23  ;;  %v2803_v19 = vadd.f32 %v3290_v8, %v2793_v52 }
 0xece   : > { %v2805_v37 = vpack.c.bf16 %v2803_v19, %v2802_v53 }
 0xed0   : > { %3616 = vmatmul.mubr.msk.bf16.vlgmr.msra.gmra.mxu0 %vm659_vm1, %v2805_v37 }
 0xf90   : > { %v3617_v1 = vpop.f32.mrf.mxu0 }
 0xf91   : > { %v2878_v3 = vadd.f32 %v3617_v1, %v3291_v0 }
 0xf92   : > { %v2869_v4 = vpop.f32.mrf.mxu0 }
 0xf93   : > { %v3298_v5 = vmul.f32 -1.702, %v2878_v3  ;;  %v2870_v6 = vadd.f32 %v3291_v0, %v2869_v4 }
 0xf94   : > { %v3618_v7 = vpop.f32.mrf.mxu0 }
 0xf95   : > { %v2896_v9 = vmul.f32 1.442695, %v3298_v5  ;;  %v3296_v10 = vmul.f32 -1.702, %v2870_v6  ;;  %v2881_v11 = vadd.f32 %v3618_v7, %v3291_v0 }
 0xf96   : > { %v2872_v16 = vpop.f32.mrf.mxu0 }
 0xf97   : > { %v2892_v17 = vmul.f32 1.442695, %v3296_v10  ;;  %v3299_v2 = vmul.f32 -1.702, %v2881_v11  ;;  %v2873_v18 = vadd.f32 %v3291_v0, %v2872_v16  ;;  %3781 = vpow2.f32 %v2896_v9 }
 0xf99   : > { %3783 = vpow2.f32 %v2892_v17  ;;  %v2898_v20 = vmul.f32 1.442695, %v3299_v2  ;;  %v3297_v21 = vmul.f32 -1.702, %v2873_v18 }
 0xf9b   : > { %3785 = vpow2.f32 %v2898_v20  ;;  %v2894_v22 = vmul.f32 1.442695, %v3297_v21 }
 0xf9d   : > { %3787 = vpow2.f32 %v2894_v22 }
 0xfa4   : > { %v3782_v24 = vpop.eup %3781 }
 0xfa5   : > { %v2902_v28 = vadd.f32 1.0, %v3782_v24 }
 0xfa6   : > { %v3784_v25 = vpop.eup %3783 }
 0xfa7   : > { %v2900_v26 = vadd.f32 1.0, %v3784_v25 }
 0xfa8   : > { %v3786_v27 = vpop.eup %3785 }
 0xfa9   : > { %v2903_v29 = vadd.f32 1.0, %v3786_v27  ;;  %3789 = vrcp.f32 %v2900_v26 }
 0xfaa   : > { %v3788_v30 = vpop.eup %3787 }
 0xfab   : > { %3791 = vrcp.f32 %v2903_v29  ;;  %v2901_v31 = vadd.f32 1.0, %v3788_v30 }
 0xfac   : > { %3793 = vrcp.f32 %v2902_v28 }
 0xfad   : > { %3795 = vrcp.f32 %v2901_v31 }
 0xfb6   : > { %v3790_v32 = vpop.eup %3789 }
 0xfb7   : > { %v2912_v38 = vmul.f32 %v3790_v32, %v2870_v6 }
 0xfb8   : > { %v3792_v33 = vpop.eup %3791 }
 0xfb9   : > { %v3794_v34 = vpop.eup %3793  ;;  %v2915_v36 = vmul.f32 %v3792_v33, %v2881_v11 }
 0xfba   : > { %v3796_v35 = vpop.eup %3795  ;;  %v2914_v40 = vmul.f32 %v3794_v34, %v2878_v3 }
 0xfbb   : > { %v2913_v39 = vmul.f32 %v3796_v35, %v2873_v18 }
 0xfbc   : > { %v2917_v42 = vpack.c.bf16 %v2915_v36, %v2914_v40 }
 0xfbd   : > { %v2916_v41 = vpack.c.bf16 %v2913_v39, %v2912_v38 }
 0xfbf   : > { %3635 = vmatprep.mubr.bf16.mxu1 %v2916_v41 }
 0xfc0   : > { %3636 = vmatmul.mubr.bf16.vlgmr.msra.gmra.mxu1 %v2917_v42 }
0x1080   : > { %v3637_v44 = vpop.f32.mrf.mxu1 }
0x1081   : > { %v3032_v45 = vadd.f32 %v3637_v44, %v3300_v43 }
0x1082   : > { %v3023_v46 = vpop.f32.mrf.mxu1 }
0x1083   : > { %v3040_v47 = vadd.f32 %v3032_v45, %v4352_v15  ;;  %v3024_v8 = vadd.f32 %v3300_v43, %v3023_v46 }
0x1084   : > { %v3638_v48 = vpop.f32.mrf.mxu1 }
0x1085   : > { %3044 = vst.msk [vmem:[#allocation3 + $0x10] sm:$0xff] %vm659_vm1, %v3040_v47  ;;  %v3038_v49 = vadd.f32 %v3024_v8, %v4350_v51  ;;  %v3035_v14 = vadd.f32 %v3638_v48, %v3300_v43 }
0x1086   : > { %v3026_v50 = vpop.f32.mrf.mxu1 }
0x1087   : > { %3042 = vst.msk [vmem:[#allocation3] sm:$0xff] %vm659_vm1, %v3038_v49  ;;  %v3041_v12 = vadd.f32 %v3035_v14, %v4358_v58  ;;  %v3027_v13 = vadd.f32 %v3300_v43, %v3026_v50 }
0x1089   : > { %3045 = vst.msk [vmem:[#allocation3 + $0x18] sm:$0xff] %vm659_vm1, %v3041_v12  ;;  %v3039_v15 = vadd.f32 %v3027_v13, %v4356_v56 }
0x108b   : > { %3043 = vst.msk [vmem:[#allocation3 + $0x8] sm:$0xff] %vm659_vm1, %v3039_v15 }
0x108c   : > { %3814 = shalt.err (!%p3811_p13)
}
0x108d   : > { %s3870_s28 = smov 128   ;;  %s4475_s13 = sld [smem:[#allocation12_spill]] }
0x1093   : > { %3640 = dma.vmem_to_hbm [thread:$0]  (%p4413_p6), %s3056_s24, 512, %s4475_s13, [#allocation4], %s3870_s28, %s3870_s28, %s3866_s20  }
0x1094   : > { %3838 = dma.done.wait (%p4413_p6), [#allocation4], 512  }
0x1095   : > { %3840 = vsyncadd (%p4413_p6), [#allocation4], 4294966784 }
0x1096 PF: > { %s4476_s25 = sld [smem:[#allocation7_spill]] }
0x1097   : > { %s4478_s26 = sld [smem:[#allocation8_spill]] }
0x109c   : > { %s24_s27 = sadd.s32 1, %s4476_s25   ;;  %s4477_s25 = sld [smem:[#allocation6_spill]] }
0x109d   : > { %p21_p0 = scmp.ge.s32.totalorder %s24_s27, 4  }
0x109f   :  { %23 = sbr.rel (!%p21_p0) target bundleno = 6 (0x6), region = 140 }
0x10a4   :  { %3071 = vsyncpa [#allocation4], 1 }
0x10a5   :  { %3073 = vsyncpa [#allocation4 + $0x1], 1 }

</bundles_post_ra>
